<compile_context>
chip_gen: v5e
topology: v5e:2x2
jax: 0.10.0
libtpu: 0.0.40
codegen_flags: <defaults>
</compile_context>

<pallas_src>
import math
from functools import partial

import jax
import jax.numpy as jnp
from jax.experimental import pallas as pl
from jax.experimental.pallas import tpu as pltpu


def _round_up(n, m):
    return ((n + m - 1) // m) * m


def _silu(v):
    # v * sigmoid(v) == v / (1 + exp(-v)); exp and the divide map to the EUP.
    return v / (1.0 + jnp.exp(-v))


HEAD_ORDER = ["conv3d_fourier", "fc0_fourier", "fc1_fourier",
              "conv3d_image", "fc0_image", "fc1_image"]


# ----------------------------------------------------------------- kernel ----
def hypernet_kernel(x_ref, ximg_ref,
                    wf0_ref, wf1_ref, wf2_ref, wf3_ref,
                    w1_ref, w2_ref, w5_ref,
                    out_ref):
    """Fused HyperNetwork forward for one batch tile.

    Packed weight layout (built once in prepare_hypernet_weights; every offset
    used below is a multiple of 8 sublanes):
      wf0 : rows [0:768] = fc0 W, row 768 = fc0 b
      wf1 : rows [0:64]  = fc1 W, row 64  = fc1 b        (wf2 identical layout)
      wf3 : rows [0:64]  = fc3 W, row 64  = fc3 b, output lane-padded to P (0s)
      w1  : rows [0:P]   = lin01 W over x_full, row P = b
      w2  : rows [0:32]  = lin02 W (dx rows), rows [32:32+P] = x_full rows,
            row 32+P = b
      w5  : rows [0:128] = fused 6-head W (dx rows), rows [128:128+P] = x_full
            rows, row 128+P = fused bias; N lane-padded to a multiple of 128.
    x_full lane order is [h_0 .. h_{k-1}, 0 .., x @ lane P-1]; the packed
    weight rows were re-ordered to match (PyTorch order was [x, h...]).

    NOTE (partial tail block invariant): when B % TB != 0 the surplus rows of
    the last block carry garbage through exp/div — harmless because every op
    is row-wise independent and out-of-bounds rows are masked on the output
    store.  Do NOT add any reduction over the batch axis inside this kernel.
    """
    f32 = jnp.float32
    cdt = wf0_ref.dtype                       # matmul operand dtype (bf16/f32)
    P = wf3_ref.shape[1]                      # padded input_size
    D1 = w1_ref.shape[1]                      # 32
    D2 = w2_ref.shape[1]                      # 128
    DIMG = ximg_ref.shape[1]                  # 768

    x = x_ref[...].astype(f32)                # (TB, 1)
    # Cast activations on the VPU inside the kernel: the HBM stream stays in
    # the producer's dtype (no wrapper-side cast round trip through HBM).
    ximg = ximg_ref[...].astype(cdt)          # (TB, 768)

    def lin(a, w_ref, k):
        # y = a @ W + b with W = rows [0:k], b = row k of the packed array.
        return (jnp.dot(a, w_ref[0:k, :], preferred_element_type=f32)
                + w_ref[k:k + 1, :].astype(f32))

    # self.fc: Flatten -> Linear(768,64) -> SiLU -> Linear(64,64) -> SiLU
    #          -> Linear(64,64) -> SiLU -> Linear(64, input_size-1)
    h = _silu(lin(ximg, wf0_ref, DIMG)).astype(cdt)
    h = _silu(lin(h, wf1_ref, 64)).astype(cdt)
    h = _silu(lin(h, wf2_ref, 64)).astype(cdt)
    h = lin(h, wf3_ref, 64)                   # (TB, P) f32, lanes >= in-1 are 0

    # x_full = cat(x, h): splice x into the (guaranteed-zero) last lane of h.
    # TODO(synk): in the bf16 path x is rounded to bf16 here; add an f32
    # rank-1 side update if the conditioning scalar needs full precision.
    lane = jax.lax.broadcasted_iota(jnp.int32, h.shape, dimension=1)
    xf = jnp.where(lane == P - 1, x, h).astype(cdt)              # (TB, P)

    # dx = ReLU(lin01(x_full))           (self.silu is nn.ReLU in the module)
    d1 = jnp.maximum(lin(xf, w1_ref, P), 0.0).astype(cdt)        # (TB, 32)

    # dx = ReLU(lin02(cat(dx, x_full))).  Kept as two dots + add: the lane
    # concat boundary (32) is not 128-aligned and the saved add is only
    # (TB, 128) — negligible.
    d2 = (jnp.dot(d1, w2_ref[0:D1, :], preferred_element_type=f32)
          + jnp.dot(xf, w2_ref[D1:D1 + P, :], preferred_element_type=f32)
          + w2_ref[D1 + P:D1 + P + 1, :].astype(f32))
    d2 = jnp.maximum(d2, 0.0).astype(cdt)                        # (TB, 128)

    # All six lin05_* heads fused into ONE lane-padded matmul over the
    # concatenated operand [dx, x_full].  The concat boundary is 128 lanes
    # (vreg-aligned), and the single dot removes the full-width (TB, NOUT)
    # f32 add that the split two-dot form needed.
    d2xf = jnp.concatenate([d2, xf], axis=1)                     # (TB, 128+P)
    out = lin(d2xf, w5_ref, D2 + P)                              # (TB, NOUT) f32
    out_ref[...] = out.astype(out_ref.dtype)


# ----------------------------------------------------------- param packing ----
def _init_linear(key, fan_in, fan_out):
    """PyTorch-style default init (uniform +-1/sqrt(fan_in)), stored transposed
    as (in_features, out_features) so y = x @ W + b."""
    kw, kb = jax.random.split(key)
    bound = 1.0 / math.sqrt(fan_in)
    w = jax.random.uniform(kw, (fan_in, fan_out), jnp.float32, -bound, bound)
    b = jax.random.uniform(kb, (1, fan_out), jnp.float32, -bound, bound)
    return w, b


def make_hypernet_params(key, input_size, channel_n, kernel_size,
                         hidden_size, extra_channels):
    fourier_fac = 1
    sizes = {
        "conv3d_fourier": (channel_n * fourier_fac + extra_channels) * kernel_size * kernel_size,
        "fc0_fourier": (channel_n * 2 * fourier_fac + extra_channels * 2) * hidden_size,
        "fc1_fourier": hidden_size * channel_n * fourier_fac,
        "conv3d_image": (channel_n + extra_channels) * kernel_size * kernel_size,
        "fc0_image": (channel_n * 2 + extra_channels * 2) * hidden_size,
        "fc1_image": hidden_size * channel_n,
    }
    keys = jax.random.split(key, 12)
    p = {
        "fc0": _init_linear(keys[0], 16 * 16 * 3, 64),
        "fc1": _init_linear(keys[1], 64, 64),
        "fc2": _init_linear(keys[2], 64, 64),
        "fc3": _init_linear(keys[3], 64, input_size - 1),
        "lin01": _init_linear(keys[4], input_size, 32),
        "lin02": _init_linear(keys[5], 32 + input_size, 128),
    }
    for i, name in enumerate(HEAD_ORDER):
        p["lin05_" + name] = _init_linear(keys[6 + i], 128 + input_size, sizes[name])
    return p, sizes


def prepare_hypernet_weights(params, input_size, compute_dtype=jnp.bfloat16):
    """One-time packing of the parameters into the kernel layout (hoisted out
    of the per-call path).  All slicing / the 6-head concat happen exactly
    once.  compute_dtype defaults to bf16 (MXU-native on all three gens)."""
    P = _round_up(input_size, 8)      # padded x_full width
    k = input_size - 1                # width of the fc output (h)

    def pack_wb(w, b, out_cols=None):
        din, dout = w.shape
        out_cols = dout if out_cols is None else out_cols
        m = jnp.zeros((_round_up(din + 1, 8), out_cols), jnp.float32)
        m = m.at[:din, :dout].set(w)
        m = m.at[din, :dout].set(b.reshape(-1))
        return m.astype(compute_dtype)

    def pack_lin(w, b, d_rows):
        # w: (d_rows + input_size, N); row d_rows is the x row (PyTorch order).
        n = w.shape[1]
        m = jnp.zeros((_round_up(d_rows + P + 1, 8), n), jnp.float32)
        if d_rows:
            m = m.at[:d_rows, :].set(w[:d_rows])
        m = m.at[d_rows:d_rows + k, :].set(w[d_rows + 1:])      # h rows first
        m = m.at[d_rows + P - 1, :].set(w[d_rows])              # x row last
        m = m.at[d_rows + P, :].set(b.reshape(-1))              # bias row
        return m.astype(compute_dtype)

    wf0 = pack_wb(*params["fc0"])
    wf1 = pack_wb(*params["fc1"])
    wf2 = pack_wb(*params["fc2"])
    wf3 = pack_wb(*params["fc3"], out_cols=P)   # zero-pad output lanes to P

    w1p = pack_lin(*params["lin01"], d_rows=0)
    w2p = pack_lin(*params["lin02"], d_rows=32)

    W5 = jnp.concatenate([params["lin05_" + n][0] for n in HEAD_ORDER], axis=1)
    b5 = jnp.concatenate([params["lin05_" + n][1] for n in HEAD_ORDER], axis=1)
    total_out = W5.shape[1]
    n_pad = _round_up(total_out, 128)           # 1132 -> 1152 lane-dense output
    if n_pad != total_out:
        W5 = jnp.pad(W5, ((0, 0), (0, n_pad - total_out)))
        b5 = jnp.pad(b5, ((0, 0), (0, n_pad - total_out)))
    w5p = pack_lin(W5, b5, d_rows=128)

    return (wf0, wf1, wf2, wf3, w1p, w2p, w5p)


# ----------------------------------------------------------------- forward ----
def _choose_batch_tile(B, max_tile=1024):
    """Sublane-aligned batch tile.  Never larger than B (so no activation
    padding / extra HBM copies are ever needed; tail blocks may be partial and
    are masked by Pallas), and >= 2 grid steps whenever the batch allows so
    v7x's two TensorCores both get work on the 'parallel' batch axis."""
    if B <= 8:
        return B                               # single block == full batch dim
    half = _round_up(pl.cdiv(B, 2), 8)
    return int(min(max_tile, half))


@partial(jax.jit, static_argnames=("out_dtype",))
def _hypernet_pallas(x, x_img, weights, out_dtype):
    wf0, wf1, wf2, wf3, w1p, w2p, w5p = weights
    B = x.shape[0]
    ximg = x_img.reshape(B, -1)                 # (B, 768), NCHW flatten order,
    DIMG = ximg.shape[1]                        # kept in the producer's dtype
    NOUT = w5p.shape[1]
    P = wf3.shape[1]

    TB = _choose_batch_tile(B)
    steps = pl.cdiv(B, TB)                      # tail block (if any) is partial
    x = x.astype(jnp.float32)                   # tiny conditioning scalar

    def batch_spec(width):
        return pl.BlockSpec((TB, width), lambda i: (i, 0))

    def resident(arr):
        # Constant index_map -> DMA'd once, stays VMEM-resident across the
        # grid.  (Total weight footprint < 0.5 MB in bf16; we skip
        # pl.Buffered(1) single-buffering to stay version-portable.)
        return pl.BlockSpec(arr.shape, lambda i: (0, 0))

    rows = steps * TB
    flops = 2 * rows * (DIMG * 64 + 64 * 64 + 64 * 64 + 64 * P
                        + P * 32 + (32 + P) * 128 + (128 + P) * NOUT)
    weight_bytes = sum(int(w.size) * w.dtype.itemsize for w in weights)
    bytes_accessed = (rows * (x.dtype.itemsize
                              + DIMG * ximg.dtype.itemsize
                              + NOUT * jnp.dtype(out_dtype).itemsize)
                      + weight_bytes)
    cost = pl.CostEstimate(flops=int(flops),
                           transcendentals=int(rows * 3 * 64),
                           bytes_accessed=int(bytes_accessed))

    return pl.pallas_call(
        hypernet_kernel,
        out_shape=jax.ShapeDtypeStruct((B, NOUT), out_dtype),
        grid=(steps,),
        in_specs=[batch_spec(1), batch_spec(DIMG),
                  resident(wf0), resident(wf1), resident(wf2), resident(wf3),
                  resident(w1p), resident(w2p), resident(w5p)],
        out_specs=pl.BlockSpec((TB, NOUT), lambda i: (i, 0)),
        compiler_params=pltpu.CompilerParams(
            dimension_semantics=("parallel",),
            vmem_limit_bytes=40 * 1024 * 1024),
        cost_estimate=cost,
    )(x, ximg, wf0, wf1, wf2, wf3, w1p, w2p, w5p)


def hypernetwork_forward(weights, sizes, x, x_img, out_dtype=None):
    """weights: output of prepare_hypernet_weights (packed once).
    Output dtype defaults to the packed compute dtype (bf16 in production);
    the fused head tensor is the largest HBM stream, so keep it narrow and
    upcast downstream only where f32 is truly needed."""
    if out_dtype is None:
        out_dtype = weights[0].dtype
    out = _hypernet_pallas(x, x_img, weights, out_dtype=jnp.dtype(out_dtype))
    gen = {"fourier": {}, "image": {}}
    off = 0
    for name in HEAD_ORDER:                     # padding lanes never referenced
        n = sizes[name]
        layer, branch = name.rsplit("_", 1)
        gen[branch][layer] = out[:, off:off + n]
        off += n
    return gen


# --------------------------------------------------------------- reference ----
def _reference_forward(params, x, x_img):
    """Pure-JAX reference mirroring the PyTorch module line by line."""
    B = x.shape[0]
    h = x_img.reshape(B, -1)
    for kname in ["fc0", "fc1", "fc2"]:
        w, b = params[kname]
        h = _silu(h @ w + b)
    w, b = params["fc3"]
    h = h @ w + b
    xf = jnp.concatenate([x, h], axis=1)
    w, b = params["lin01"]
    dx = jnp.maximum(xf @ w + b, 0.0)
    dx = jnp.concatenate([dx, xf], axis=1)
    w, b = params["lin02"]
    dx = jnp.maximum(dx @ w + b, 0.0)
    dx = jnp.concatenate([dx, xf], axis=1)
    gen = {"fourier": {}, "image": {}}
    for name in HEAD_ORDER:
        w, b = params["lin05_" + name]
        layer, branch = name.rsplit("_", 1)
        gen[branch][layer] = dx @ w + b
    return gen


if __name__ == "__main__":
    # Small configuration consistent with the module's __init__.
    input_size, channel_n, kernel_size, hidden_size, extra_channels = 8, 4, 3, 32, 2
    B = 2

    key = jax.random.PRNGKey(0)
    kp, kx, ki = jax.random.split(key, 3)
    params, sizes = make_hypernet_params(
        kp, input_size, channel_n, kernel_size, hidden_size, extra_channels)

    x = jax.random.normal(kx, (B, 1), jnp.float32)
    x_img = jax.random.normal(ki, (B, 3, 16, 16), jnp.float32)   # NCHW

    ref = _reference_forward(params, x, x_img)

    # f32-operand path: tolerance covers the backend's default (reduced-pass)
    # MXU precision for f32 matmuls, which differs between XLA and Mosaic.
    weights_f32 = prepare_hypernet_weights(params, input_size, jnp.float32)
    out = hypernetwork_forward(weights_f32, sizes, x, x_img, out_dtype=jnp.float32)
    out = jax.tree_util.tree_map(jax.block_until_ready, out)
    for branch in ("fourier", "image"):
        for layer in ("conv3d", "fc0", "fc1"):
            a, b = out[branch][layer], ref[branch][layer]
            assert a.shape == b.shape, (branch, layer, a.shape, b.shape)
            assert jnp.allclose(a, b, atol=2e-2, rtol=2e-2), (
                branch, layer, float(jnp.max(jnp.abs(a - b))))

    # bf16 production path (bf16 operands + bf16 output, f32 accumulation).
    weights_bf16 = prepare_hypernet_weights(params, input_size)   # default bf16
    out_bf = hypernetwork_forward(weights_bf16, sizes, x, x_img)  # bf16 output
    out_bf = jax.tree_util.tree_map(jax.block_until_ready, out_bf)
    for branch in ("fourier", "image"):
        for layer in ("conv3d", "fc0", "fc1"):
            a = out_bf[branch][layer].astype(jnp.float32)
            b = ref[branch][layer]
            assert a.shape == b.shape, (branch, layer, a.shape, b.shape)
            assert jnp.allclose(a, b, atol=0.3, rtol=0.3), (
                branch, layer, float(jnp.max(jnp.abs(a - b))))

    print("KERNEL_OK")
</pallas_src>

<mosaic_0001>
module attributes {stable_mosaic.version = 11 : i64} {
  func.func @hypernet_kernel(%arg0: i32, %arg1: memref<2x1xf32, #tpu.memory_space<vmem>>, %arg2: memref<2x768xf32, #tpu.memory_space<vmem>>, %arg3: memref<776x64xf32, #tpu.memory_space<vmem>>, %arg4: memref<72x64xf32, #tpu.memory_space<vmem>>, %arg5: memref<72x64xf32, #tpu.memory_space<vmem>>, %arg6: memref<72x8xf32, #tpu.memory_space<vmem>>, %arg7: memref<16x32xf32, #tpu.memory_space<vmem>>, %arg8: memref<48x128xf32, #tpu.memory_space<vmem>>, %arg9: memref<144x1152xf32, #tpu.memory_space<vmem>>, %arg10: memref<2x1152xf32, #tpu.memory_space<vmem>>) attributes {dimension_semantics = [#tpu.dimension_semantics<parallel>], iteration_bounds = array<i64: 1>, scalar_prefetch = 0 : i64, scratch_operands = 0 : i64, tpu.core_type = #tpu.core_type<tc>, window_params = [{transform_indices = @transform_0, window_bounds = array<i64: 2, 1>}, {transform_indices = @transform_1, window_bounds = array<i64: 2, 768>}, {pipeline_mode = #tpu.pipeline_mode<synchronous>, transform_indices = @transform_2, window_bounds = array<i64: 776, 64>}, {pipeline_mode = #tpu.pipeline_mode<synchronous>, transform_indices = @transform_3, window_bounds = array<i64: 72, 64>}, {pipeline_mode = #tpu.pipeline_mode<synchronous>, transform_indices = @transform_4, window_bounds = array<i64: 72, 64>}, {pipeline_mode = #tpu.pipeline_mode<synchronous>, transform_indices = @transform_5, window_bounds = array<i64: 72, 8>}, {pipeline_mode = #tpu.pipeline_mode<synchronous>, transform_indices = @transform_6, window_bounds = array<i64: 16, 32>}, {pipeline_mode = #tpu.pipeline_mode<synchronous>, transform_indices = @transform_7, window_bounds = array<i64: 48, 128>}, {pipeline_mode = #tpu.pipeline_mode<synchronous>, transform_indices = @transform_8, window_bounds = array<i64: 144, 1152>}, {transform_indices = @transform_9, window_bounds = array<i64: 2, 1152>}]} {
    %c0 = arith.constant 0 : index
    %c0_0 = arith.constant 0 : index
    %0 = vector.load %arg1[%c0, %c0_0] : memref<2x1xf32, #tpu.memory_space<vmem>>, vector<2x1xf32>
    %c0_1 = arith.constant 0 : index
    %c0_2 = arith.constant 0 : index
    %1 = vector.load %arg2[%c0_1, %c0_2] : memref<2x768xf32, #tpu.memory_space<vmem>>, vector<2x768xf32>
    %c0_3 = arith.constant 0 : index
    %c0_4 = arith.constant 0 : index
    %2 = vector.load %arg3[%c0_3, %c0_4] : memref<776x64xf32, #tpu.memory_space<vmem>>, vector<768x64xf32>
    %cst = arith.constant dense<0.000000e+00> : vector<2x64xf32>
    %3 = tpu.matmul %1, %2, %cst {dimension_numbers = #tpu.dot_dimension_numbers<[1], [0], [0], [1], [0, 0, 1, 1], [], []>} : vector<2x768xf32>, vector<768x64xf32>, vector<2x64xf32> -> vector<2x64xf32>
    %c768 = arith.constant 768 : index
    %c0_5 = arith.constant 0 : index
    %4 = vector.load %arg3[%c768, %c0_5] : memref<776x64xf32, #tpu.memory_space<vmem>>, vector<1x64xf32>
    %5 = vector.broadcast %4 : vector<1x64xf32> to vector<2x64xf32>
    %6 = arith.addf %3, %5 : vector<2x64xf32>
    %cst_6 = arith.constant 0.000000e+00 : f32
    %7 = vector.broadcast %cst_6 : f32 to vector<2x64xf32>
    %8 = arith.subf %7, %6 : vector<2x64xf32>
    %9 = math.exp %8 : vector<2x64xf32>
    %cst_7 = arith.constant 1.000000e+00 : f32
    %10 = vector.broadcast %cst_7 : f32 to vector<2x64xf32>
    %11 = arith.addf %10, %9 : vector<2x64xf32>
    %12 = arith.divf %6, %11 : vector<2x64xf32>
    %c0_8 = arith.constant 0 : index
    %c0_9 = arith.constant 0 : index
    %13 = vector.load %arg4[%c0_8, %c0_9] : memref<72x64xf32, #tpu.memory_space<vmem>>, vector<64x64xf32>
    %cst_10 = arith.constant dense<0.000000e+00> : vector<2x64xf32>
    %14 = tpu.matmul %12, %13, %cst_10 {dimension_numbers = #tpu.dot_dimension_numbers<[1], [0], [0], [1], [0, 0, 1, 1], [], []>} : vector<2x64xf32>, vector<64x64xf32>, vector<2x64xf32> -> vector<2x64xf32>
    %c64 = arith.constant 64 : index
    %c0_11 = arith.constant 0 : index
    %15 = vector.load %arg4[%c64, %c0_11] : memref<72x64xf32, #tpu.memory_space<vmem>>, vector<1x64xf32>
    %16 = vector.broadcast %15 : vector<1x64xf32> to vector<2x64xf32>
    %17 = arith.addf %14, %16 : vector<2x64xf32>
    %cst_12 = arith.constant 0.000000e+00 : f32
    %18 = vector.broadcast %cst_12 : f32 to vector<2x64xf32>
    %19 = arith.subf %18, %17 : vector<2x64xf32>
    %20 = math.exp %19 : vector<2x64xf32>
    %cst_13 = arith.constant 1.000000e+00 : f32
    %21 = vector.broadcast %cst_13 : f32 to vector<2x64xf32>
    %22 = arith.addf %21, %20 : vector<2x64xf32>
    %23 = arith.divf %17, %22 : vector<2x64xf32>
    %c0_14 = arith.constant 0 : index
    %c0_15 = arith.constant 0 : index
    %24 = vector.load %arg5[%c0_14, %c0_15] : memref<72x64xf32, #tpu.memory_space<vmem>>, vector<64x64xf32>
    %cst_16 = arith.constant dense<0.000000e+00> : vector<2x64xf32>
    %25 = tpu.matmul %23, %24, %cst_16 {dimension_numbers = #tpu.dot_dimension_numbers<[1], [0], [0], [1], [0, 0, 1, 1], [], []>} : vector<2x64xf32>, vector<64x64xf32>, vector<2x64xf32> -> vector<2x64xf32>
    %c64_17 = arith.constant 64 : index
    %c0_18 = arith.constant 0 : index
    %26 = vector.load %arg5[%c64_17, %c0_18] : memref<72x64xf32, #tpu.memory_space<vmem>>, vector<1x64xf32>
    %27 = vector.broadcast %26 : vector<1x64xf32> to vector<2x64xf32>
    %28 = arith.addf %25, %27 : vector<2x64xf32>
    %cst_19 = arith.constant 0.000000e+00 : f32
    %29 = vector.broadcast %cst_19 : f32 to vector<2x64xf32>
    %30 = arith.subf %29, %28 : vector<2x64xf32>
    %31 = math.exp %30 : vector<2x64xf32>
    %cst_20 = arith.constant 1.000000e+00 : f32
    %32 = vector.broadcast %cst_20 : f32 to vector<2x64xf32>
    %33 = arith.addf %32, %31 : vector<2x64xf32>
    %34 = arith.divf %28, %33 : vector<2x64xf32>
    %c0_21 = arith.constant 0 : index
    %c0_22 = arith.constant 0 : index
    %35 = vector.load %arg6[%c0_21, %c0_22] : memref<72x8xf32, #tpu.memory_space<vmem>>, vector<64x8xf32>
    %cst_23 = arith.constant dense<0.000000e+00> : vector<2x8xf32>
    %36 = tpu.matmul %34, %35, %cst_23 {dimension_numbers = #tpu.dot_dimension_numbers<[1], [0], [0], [1], [0, 0, 1, 1], [], []>} : vector<2x64xf32>, vector<64x8xf32>, vector<2x8xf32> -> vector<2x8xf32>
    %c64_24 = arith.constant 64 : index
    %c0_25 = arith.constant 0 : index
    %37 = vector.load %arg6[%c64_24, %c0_25] : memref<72x8xf32, #tpu.memory_space<vmem>>, vector<1x8xf32>
    %38 = vector.broadcast %37 : vector<1x8xf32> to vector<2x8xf32>
    %39 = arith.addf %36, %38 : vector<2x8xf32>
    %40 = tpu.iota {dimensions = array<i32: 1>} : vector<2x8xi32>
    %c7_i32 = arith.constant 7 : i32
    %41 = vector.broadcast %c7_i32 : i32 to vector<2x8xi32>
    %42 = arith.cmpi eq, %40, %41 : vector<2x8xi32>
    %43 = vector.shape_cast %0 : vector<2x1xf32> to vector<2x1xf32>
    %44 = vector.broadcast %43 : vector<2x1xf32> to vector<2x8xf32>
    %45 = arith.select %42, %44, %39 : vector<2x8xi1>, vector<2x8xf32>
    %c0_26 = arith.constant 0 : index
    %c0_27 = arith.constant 0 : index
    %46 = vector.load %arg7[%c0_26, %c0_27] : memref<16x32xf32, #tpu.memory_space<vmem>>, vector<8x32xf32>
    %cst_28 = arith.constant dense<0.000000e+00> : vector<2x32xf32>
    %47 = tpu.matmul %45, %46, %cst_28 {dimension_numbers = #tpu.dot_dimension_numbers<[1], [0], [0], [1], [0, 0, 1, 1], [], []>} : vector<2x8xf32>, vector<8x32xf32>, vector<2x32xf32> -> vector<2x32xf32>
    %c8 = arith.constant 8 : index
    %c0_29 = arith.constant 0 : index
    %48 = vector.load %arg7[%c8, %c0_29] : memref<16x32xf32, #tpu.memory_space<vmem>>, vector<1x32xf32>
    %49 = vector.broadcast %48 : vector<1x32xf32> to vector<2x32xf32>
    %50 = arith.addf %47, %49 : vector<2x32xf32>
    %cst_30 = arith.constant 0.000000e+00 : f32
    %51 = vector.broadcast %cst_30 : f32 to vector<2x32xf32>
    %52 = arith.maximumf %50, %51 : vector<2x32xf32>
    %c0_31 = arith.constant 0 : index
    %c0_32 = arith.constant 0 : index
    %53 = vector.load %arg8[%c0_31, %c0_32] : memref<48x128xf32, #tpu.memory_space<vmem>>, vector<32x128xf32>
    %cst_33 = arith.constant dense<0.000000e+00> : vector<2x128xf32>
    %54 = tpu.matmul %52, %53, %cst_33 {dimension_numbers = #tpu.dot_dimension_numbers<[1], [0], [0], [1], [0, 0, 1, 1], [], []>} : vector<2x32xf32>, vector<32x128xf32>, vector<2x128xf32> -> vector<2x128xf32>
    %c32 = arith.constant 32 : index
    %c0_34 = arith.constant 0 : index
    %55 = vector.load %arg8[%c32, %c0_34] : memref<48x128xf32, #tpu.memory_space<vmem>>, vector<8x128xf32>
    %cst_35 = arith.constant dense<0.000000e+00> : vector<2x128xf32>
    %56 = tpu.matmul %45, %55, %cst_35 {dimension_numbers = #tpu.dot_dimension_numbers<[1], [0], [0], [1], [0, 0, 1, 1], [], []>} : vector<2x8xf32>, vector<8x128xf32>, vector<2x128xf32> -> vector<2x128xf32>
    %57 = arith.addf %54, %56 : vector<2x128xf32>
    %c40 = arith.constant 40 : index
    %c0_36 = arith.constant 0 : index
    %58 = vector.load %arg8[%c40, %c0_36] : memref<48x128xf32, #tpu.memory_space<vmem>>, vector<1x128xf32>
    %59 = vector.broadcast %58 : vector<1x128xf32> to vector<2x128xf32>
    %60 = arith.addf %57, %59 : vector<2x128xf32>
    %cst_37 = arith.constant 0.000000e+00 : f32
    %61 = vector.broadcast %cst_37 : f32 to vector<2x128xf32>
    %62 = arith.maximumf %60, %61 : vector<2x128xf32>
    %63 = tpu.concatenate %62, %45 in 1 : vector<2x128xf32>, vector<2x8xf32> -> vector<2x136xf32>
    %c0_38 = arith.constant 0 : index
    %c0_39 = arith.constant 0 : index
    %64 = vector.load %arg9[%c0_38, %c0_39] : memref<144x1152xf32, #tpu.memory_space<vmem>>, vector<136x1152xf32>
    %cst_40 = arith.constant dense<0.000000e+00> : vector<2x1152xf32>
    %65 = tpu.matmul %63, %64, %cst_40 {dimension_numbers = #tpu.dot_dimension_numbers<[1], [0], [0], [1], [0, 0, 1, 1], [], []>} : vector<2x136xf32>, vector<136x1152xf32>, vector<2x1152xf32> -> vector<2x1152xf32>
    %c136 = arith.constant 136 : index
    %c0_41 = arith.constant 0 : index
    %66 = vector.load %arg9[%c136, %c0_41] : memref<144x1152xf32, #tpu.memory_space<vmem>>, vector<1x1152xf32>
    %67 = vector.broadcast %66 : vector<1x1152xf32> to vector<2x1152xf32>
    %68 = arith.addf %65, %67 : vector<2x1152xf32>
    %c0_42 = arith.constant 0 : index
    %c0_43 = arith.constant 0 : index
    %69 = vector.load %arg10[%c0_42, %c0_43] : memref<2x1152xf32, #tpu.memory_space<vmem>>, vector<2x1152xf32>
    tpu.vector_store %arg10[%c0_42, %c0_43], %68 {strides = array<i32>} : memref<2x1152xf32, #tpu.memory_space<vmem>>, vector<2x1152xf32>,
    return
  }
  func.func @transform_0(%arg0: i32) -> (i32, i32) {
    %c0_i32 = arith.constant 0 : i32
    %c0_i32_0 = arith.constant 0 : i32
    return %arg0, %c0_i32 : i32, i32
  }
  func.func @transform_1(%arg0: i32) -> (i32, i32) {
    %c0_i32 = arith.constant 0 : i32
    %c0_i32_0 = arith.constant 0 : i32
    return %arg0, %c0_i32 : i32, i32
  }
  func.func @transform_2(%arg0: i32) -> (i32, i32) {
    %c0_i32 = arith.constant 0 : i32
    %c0_i32_0 = arith.constant 0 : i32
    %c0_i32_1 = arith.constant 0 : i32
    return %c0_i32, %c0_i32_0 : i32, i32
  }
  func.func @transform_3(%arg0: i32) -> (i32, i32) {
    %c0_i32 = arith.constant 0 : i32
    %c0_i32_0 = arith.constant 0 : i32
    %c0_i32_1 = arith.constant 0 : i32
    return %c0_i32, %c0_i32_0 : i32, i32
  }
  func.func @transform_4(%arg0: i32) -> (i32, i32) {
    %c0_i32 = arith.constant 0 : i32
    %c0_i32_0 = arith.constant 0 : i32
    %c0_i32_1 = arith.constant 0 : i32
    return %c0_i32, %c0_i32_0 : i32, i32
  }
  func.func @transform_5(%arg0: i32) -> (i32, i32) {
    %c0_i32 = arith.constant 0 : i32
    %c0_i32_0 = arith.constant 0 : i32
    %c0_i32_1 = arith.constant 0 : i32
    return %c0_i32, %c0_i32_0 : i32, i32
  }
  func.func @transform_6(%arg0: i32) -> (i32, i32) {
    %c0_i32 = arith.constant 0 : i32
    %c0_i32_0 = arith.constant 0 : i32
    %c0_i32_1 = arith.constant 0 : i32
    return %c0_i32, %c0_i32_0 : i32, i32
  }
  func.func @transform_7(%arg0: i32) -> (i32, i32) {
    %c0_i32 = arith.constant 0 : i32
    %c0_i32_0 = arith.constant 0 : i32
    %c0_i32_1 = arith.constant 0 : i32
    return %c0_i32, %c0_i32_0 : i32, i32
  }
  func.func @transform_8(%arg0: i32) -> (i32, i32) {
    %c0_i32 = arith.constant 0 : i32
    %c0_i32_0 = arith.constant 0 : i32
    %c0_i32_1 = arith.constant 0 : i32
    return %c0_i32, %c0_i32_0 : i32, i32
  }
  func.func @transform_9(%arg0: i32) -> (i32, i32) {
    %c0_i32 = arith.constant 0 : i32
    %c0_i32_0 = arith.constant 0 : i32
    return %arg0, %c0_i32 : i32, i32
  }
}

</mosaic_0001>

<bundles_post_ra>
// kernel: _hypernet_pallas.1
= control target key start
LH: loop header
LB: loop body
LE: loop exit
PB: predicated region body
PF: predicated region fallthrough
CT: control target
= control target key end

     0   :  { %s2139_s0 = inlined_call_operand.vmem [shape: f32[2,1], index: 0, kind: input, shape index: {}]   ;;  %s2140_s1 = inlined_call_operand.vmem [shape: f32[2,768], index: 1, kind: input, shape index: {}]   ;;  %s2141_s2 = inlined_call_operand.vmem [shape: f32[776,64], index: 2, kind: input, shape index: {}]   ;;  %s2142_s3 = inlined_call_operand.vmem [shape: f32[72,64], index: 3, kind: input, shape index: {}]   ;;  %s2143_s4 = inlined_call_operand.vmem [shape: f32[72,64], index: 4, kind: input, shape index: {}]   ;;  %s2144_s5 = inlined_call_operand.vmem [shape: f32[72,8], index: 5, kind: input, shape index: {}]   ;;  %s2145_s6 = inlined_call_operand.vmem [shape: f32[16,32], index: 6, kind: input, shape index: {}]   ;;  %s2146_s7 = inlined_call_operand.vmem [shape: f32[48,128], index: 7, kind: input, shape index: {}]   ;;  %s2147_s8 = inlined_call_operand.vmem [shape: f32[144,1152], index: 8, kind: input, shape index: {}]   ;;  %s2148_s9 = inlined_call_operand.hbm [shape: f32[2,1152], index: 9, kind: output, shape index: {}]  }
   0x1   :  { %v51_v0 = vld [vmem:[%s2141_s2 + $0x78] sm:$0xff]  ;;  %v50_v1 = vld [vmem:[%s2141_s2 + $0x70] sm:$0xff]  ;;  %v49_v4 = vld [vmem:[%s2141_s2 + $0x68] sm:$0xff] }
   0x2   :  { %v67_v2 = vld [vmem:[%s2141_s2 + $0xf8] sm:$0xff]  ;;  %151 = vmatpush.msra.mxu0 %v51_v0  ;;  %v66_v3 = vld [vmem:[%s2141_s2 + $0xf0] sm:$0xff]  ;;  %v65_v5 = vld [vmem:[%s2141_s2 + $0xe8] sm:$0xff] }
   0x3   :  { %171 = vmatpush.msra.mxu1 %v67_v2  ;;  %v48_v6 = vld [vmem:[%s2141_s2 + $0x60] sm:$0xff]  ;;  %v47_v8 = vld [vmem:[%s2141_s2 + $0x58] sm:$0xff]  ;;  %v46_v10 = vld [vmem:[%s2141_s2 + $0x50] sm:$0xff] }
   0x4   :  { %152 = vmatpush.msra.mxu0 %v50_v1  ;;  %v64_v7 = vld [vmem:[%s2141_s2 + $0xe0] sm:$0xff]  ;;  %v63_v9 = vld [vmem:[%s2141_s2 + $0xd8] sm:$0xff]  ;;  %v62_v12 = vld [vmem:[%s2141_s2 + $0xd0] sm:$0xff] }
   0x5   :  { %172 = vmatpush.msra.mxu1 %v66_v3  ;;  %v83_v11 = vld [vmem:[%s2141_s2 + $0x178] sm:$0xff]  ;;  %v82_v13 = vld [vmem:[%s2141_s2 + $0x170] sm:$0xff]  ;;  %v81_v15 = vld [vmem:[%s2141_s2 + $0x168] sm:$0xff] }
   0x6   :  { %153 = vmatpush.msra.mxu0 %v49_v4  ;;  %191 = vmatpush.msra.mxu2 %v83_v11  ;;  %v99_v14 = vld [vmem:[%s2141_s2 + $0x1f8] sm:$0xff]  ;;  %v98_v16 = vld [vmem:[%s2141_s2 + $0x1f0] sm:$0xff]  ;;  %v45_v17 = vld [vmem:[%s2141_s2 + $0x48] sm:$0xff] }
   0x7   :  { %173 = vmatpush.msra.mxu1 %v65_v5  ;;  %v61_v18 = vld [vmem:[%s2141_s2 + $0xc8] sm:$0xff]  ;;  %211 = vmatpush.msra.mxu3 %v99_v14  ;;  %v80_v19 = vld [vmem:[%s2141_s2 + $0x160] sm:$0xff]  ;;  %v79_v23 = vld [vmem:[%s2141_s2 + $0x158] sm:$0xff] }
   0x8   :  { %154 = vmatpush.msra.mxu0 %v48_v6  ;;  %192 = vmatpush.msra.mxu2 %v82_v13  ;;  %v97_v20 = vld [vmem:[%s2141_s2 + $0x1e8] sm:$0xff]  ;;  %v44_v21 = vld [vmem:[%s2141_s2 + $0x40] sm:$0xff]  ;;  %v43_v25 = vld [vmem:[%s2141_s2 + $0x38] sm:$0xff] }
   0x9   :  { %174 = vmatpush.msra.mxu1 %v64_v7  ;;  %v60_v22 = vld [vmem:[%s2141_s2 + $0xc0] sm:$0xff]  ;;  %212 = vmatpush.msra.mxu3 %v98_v16  ;;  %v59_v26 = vld [vmem:[%s2141_s2 + $0xb8] sm:$0xff]  ;;  %v78_v27 = vld [vmem:[%s2141_s2 + $0x150] sm:$0xff] }
   0xa   :  { %155 = vmatpush.msra.mxu0 %v47_v8  ;;  %193 = vmatpush.msra.mxu2 %v81_v15  ;;  %v96_v24 = vld [vmem:[%s2141_s2 + $0x1e0] sm:$0xff]  ;;  %v95_v28 = vld [vmem:[%s2141_s2 + $0x1d8] sm:$0xff]  ;;  %v42_v29 = vld [vmem:[%s2141_s2 + $0x30] sm:$0xff] }
   0xb   :  { %175 = vmatpush.msra.mxu1 %v63_v9  ;;  %213 = vmatpush.msra.mxu3 %v97_v20  ;;  %v58_v30 = vld [vmem:[%s2141_s2 + $0xb0] sm:$0xff]  ;;  %v77_v31 = vld [vmem:[%s2141_s2 + $0x148] sm:$0xff]  ;;  %v76_v35 = vld [vmem:[%s2141_s2 + $0x140] sm:$0xff] }
   0xc   :  { %156 = vmatpush.msra.mxu0 %v46_v10  ;;  %194 = vmatpush.msra.mxu2 %v80_v19  ;;  %v94_v32 = vld [vmem:[%s2141_s2 + $0x1d0] sm:$0xff]  ;;  %v41_v33 = vld [vmem:[%s2141_s2 + $0x28] sm:$0xff]  ;;  %v40_v37 = vld [vmem:[%s2141_s2 + $0x20] sm:$0xff] }
   0xd   :  { %176 = vmatpush.msra.mxu1 %v62_v12  ;;  %214 = vmatpush.msra.mxu3 %v96_v24  ;;  %v57_v34 = vld [vmem:[%s2141_s2 + $0xa8] sm:$0xff]  ;;  %v56_v38 = vld [vmem:[%s2141_s2 + $0xa0] sm:$0xff]  ;;  %v75_v39 = vld [vmem:[%s2141_s2 + $0x138] sm:$0xff] }
   0xe   :  { %157 = vmatpush.msra.mxu0 %v45_v17  ;;  %195 = vmatpush.msra.mxu2 %v79_v23  ;;  %v93_v36 = vld [vmem:[%s2141_s2 + $0x1c8] sm:$0xff]  ;;  %v92_v40 = vld [vmem:[%s2141_s2 + $0x1c0] sm:$0xff]  ;;  %v39_v41 = vld [vmem:[%s2141_s2 + $0x18] sm:$0xff] }
   0xf   :  { %177 = vmatpush.msra.mxu1 %v61_v18  ;;  %215 = vmatpush.msra.mxu3 %v95_v28  ;;  %v55_v42 = vld [vmem:[%s2141_s2 + $0x98] sm:$0xff]  ;;  %v74_v43 = vld [vmem:[%s2141_s2 + $0x130] sm:$0xff]  ;;  %v73_v47 = vld [vmem:[%s2141_s2 + $0x128] sm:$0xff] }
  0x10   :  { %158 = vmatpush.msra.mxu0 %v44_v21  ;;  %196 = vmatpush.msra.mxu2 %v78_v27  ;;  %v91_v44 = vld [vmem:[%s2141_s2 + $0x1b8] sm:$0xff]  ;;  %v38_v45 = vld [vmem:[%s2141_s2 + $0x10] sm:$0xff]  ;;  %v37_v49 = vld [vmem:[%s2141_s2 + $0x8] sm:$0xff] }
  0x11   :  { %178 = vmatpush.msra.mxu1 %v60_v22  ;;  %216 = vmatpush.msra.mxu3 %v94_v32  ;;  %v54_v46 = vld [vmem:[%s2141_s2 + $0x90] sm:$0xff]  ;;  %v53_v50 = vld [vmem:[%s2141_s2 + $0x88] sm:$0xff]  ;;  %v72_v51 = vld [vmem:[%s2141_s2 + $0x120] sm:$0xff] }
  0x12   :  { %159 = vmatpush.msra.mxu0 %v43_v25  ;;  %197 = vmatpush.msra.mxu2 %v77_v31  ;;  %v90_v48 = vld [vmem:[%s2141_s2 + $0x1b0] sm:$0xff]  ;;  %v89_v52 = vld [vmem:[%s2141_s2 + $0x1a8] sm:$0xff]  ;;  %v36_v53 = vld [vmem:[%s2141_s2] sm:$0xff] }
  0x13   :  { %179 = vmatpush.msra.mxu1 %v59_v26  ;;  %217 = vmatpush.msra.mxu3 %v93_v36  ;;  %v52_v54 = vld [vmem:[%s2141_s2 + $0x80] sm:$0xff]  ;;  %v115_v56 = vld [vmem:[%s2141_s2 + $0x278] sm:$0xff]  ;;  %v114_v58 = vld [vmem:[%s2141_s2 + $0x270] sm:$0xff] }
  0x14   :  { %160 = vmatpush.msra.mxu0 %v42_v29  ;;  %198 = vmatpush.msra.mxu2 %v76_v35  ;;  %v34_v55 = vld [vmem:[%s2140_s1] sm:$0xff]  ;;  %v131_v57 = vld [vmem:[%s2141_s2 + $0x2f8] sm:$0xff]  ;;  %v113_v61 = vld [vmem:[%s2141_s2 + $0x268] sm:$0xff] }
  0x15   :  { %180 = vmatpush.msra.mxu1 %v58_v30  ;;  %218 = vmatpush.msra.mxu3 %v92_v40  ;;  %136 = vst [vmem:[#allocation1] ss:$4 sm:$0xff] %v34_v55  ;;  %v71_v59 = vld [vmem:[%s2141_s2 + $0x118] sm:$0xff]  ;;  %v88_v60 = vld [vmem:[%s2141_s2 + $0x1a0] sm:$0xff]  ;;  %v130_v62 = vld [vmem:[%s2141_s2 + $0x2f0] sm:$0xff] }
  0x16   :  { %161 = vmatpush.msra.mxu0 %v41_v33  ;;  %199 = vmatpush.msra.mxu2 %v75_v39  ;;  %v129_v63 = vld [vmem:[%s2141_s2 + $0x2e8] sm:$0xff]  ;;  %v70_v0 = vld [vmem:[%s2141_s2 + $0x110] sm:$0xff]  ;;  %v87_v1 = vld [vmem:[%s2141_s2 + $0x198] sm:$0xff] }
  0x17   :  { %181 = vmatpush.msra.mxu1 %v57_v34  ;;  %219 = vmatpush.msra.mxu3 %v91_v44  ;;  %v35_v2 = vld [vmem:[%s2140_s1 + $0x8] sm:$0xf]  ;;  %v112_v3 = vld [vmem:[%s2141_s2 + $0x260] sm:$0xff]  ;;  %v86_v5 = vld [vmem:[%s2141_s2 + $0x190] sm:$0xff] }
  0x18   :  { %162 = vmatpush.msra.mxu0 %v40_v37  ;;  %200 = vmatpush.msra.mxu2 %v74_v43  ;;  %v69_v4 = vld [vmem:[%s2141_s2 + $0x108] sm:$0xff]  ;;  %138 = vst [vmem:[#allocation1 + $0x20] ss:$4 sm:$0xff] %v35_v2  ;;  %v128_v6 = vld [vmem:[%s2141_s2 + $0x2e0] sm:$0xff]  ;;  %v111_v9 = vld [vmem:[%s2141_s2 + $0x258] sm:$0xff] }
  0x19   :  { %182 = vmatpush.msra.mxu1 %v56_v38  ;;  %220 = vmatpush.msra.mxu3 %v90_v48  ;;  %v68_v7 = vld [vmem:[%s2141_s2 + $0x100] sm:$0xff]  ;;  %v85_v8 = vld [vmem:[%s2141_s2 + $0x188] sm:$0xff]  ;;  %v127_v10 = vld [vmem:[%s2141_s2 + $0x2d8] sm:$0xff] }
  0x1a   :  { %163 = vmatpush.msra.mxu0 %v39_v41  ;;  %201 = vmatpush.msra.mxu2 %v73_v47  ;;  %v84_v12 = vld [vmem:[%s2141_s2 + $0x180] sm:$0xff] }
  0x1b   :  { %183 = vmatpush.msra.mxu1 %v55_v42  ;;  %221 = vmatpush.msra.mxu3 %v89_v52 }
  0x1c   :  { %164 = vmatpush.msra.mxu0 %v38_v45  ;;  %202 = vmatpush.msra.mxu2 %v72_v51  ;;  %v141_v11 = vld.sshfl [vmem:[#allocation1 + $0x10] sm:$0xff pattern:$0x73625140] }
  0x1d   :  { %184 = vmatpush.msra.mxu1 %v54_v46  ;;  %222 = vmatpush.msra.mxu3 %v88_v60 }
  0x1e   :  { %165 = vmatpush.msra.mxu0 %v37_v49  ;;  %203 = vmatpush.msra.mxu2 %v71_v59 }
  0x1f   :  { %185 = vmatpush.msra.mxu1 %v53_v50  ;;  %223 = vmatpush.msra.mxu3 %v87_v1 }
  0x20   :  { %166 = vmatpush.msra.mxu0 %v36_v53  ;;  %204 = vmatpush.msra.mxu2 %v70_v0 }
  0x21   :  { %186 = vmatpush.msra.mxu1 %v52_v54  ;;  %224 = vmatpush.msra.mxu3 %v86_v5 }
  0x22   :  { %231 = vmatpush.msrb.mxu0 %v115_v56  ;;  %205 = vmatpush.msra.mxu2 %v69_v4 }
  0x23   :  { %251 = vmatpush.msrb.mxu1 %v131_v57 }
  0x24   :  { %232 = vmatpush.msrb.mxu0 %v114_v58 }
  0x25   :  { %252 = vmatpush.msrb.mxu1 %v130_v62 }
  0x26   :  { %233 = vmatpush.msrb.mxu0 %v113_v61 }
  0x27   :  { %253 = vmatpush.msrb.mxu1 %v129_v63 }
  0x28   :  { %234 = vmatpush.msrb.mxu0 %v112_v3 }
  0x29   :  { %254 = vmatpush.msrb.mxu1 %v128_v6 }
  0x2a   :  { %14 = vsyncpa [#allocation3], 0  ;;  %v110_v13 = vld [vmem:[%s2141_s2 + $0x250] sm:$0xff]  ;;  %206 = vmatpush.msra.mxu2 %v68_v7  ;;  %225 = vmatpush.msra.mxu3 %v85_v8  ;;  %v142_v16 = vld.sshfl [vmem:[#allocation1 + $0x18] sm:$0xff pattern:$0x73625140] }
  0x2b   :  { %v126_v14 = vld [vmem:[%s2141_s2 + $0x2d0] sm:$0xff]  ;;  %235 = vmatpush.msrb.mxu0 %v111_v9  ;;  %255 = vmatpush.msrb.mxu1 %v127_v10  ;;  %v109_v17 = vld [vmem:[%s2141_s2 + $0x248] sm:$0xff]  ;;  %v140_v19 = vld.sshfl [vmem:[#allocation1 + $0x8] sm:$0xff pattern:$0x73625140]  ;;  %vm300_vm4 = vcmask 523264  }
  0x2c   :  { %v139_v15 = vld.sshfl [vmem:[#allocation1] sm:$0xff pattern:$0x73625140]  ;;  %v125_v18 = vld [vmem:[%s2141_s2 + $0x2c8] sm:$0xff]  ;;  %207 = vmatmul.f32.vlgmr.msra.gmra.mxu2 %v141_v11  ;;  %226 = vmatpush.msra.mxu3 %v84_v12  ;;  %v108_v20 = vld [vmem:[%s2141_s2 + $0x240] sm:$0xff]  ;;  %vm440_vm14 = vcmask 64512  }
  0x2d   :  { %236 = vmatpush.msrb.mxu0 %v110_v13  ;;  %256 = vmatpush.msrb.mxu1 %v126_v14  ;;  %v124_v21 = vld [vmem:[%s2141_s2 + $0x2c0] sm:$0xff]  ;;  %v107_v22 = vld [vmem:[%s2141_s2 + $0x238] sm:$0xff]  ;;  %v106_v24 = vld [vmem:[%s2141_s2 + $0x230] sm:$0xff]  ;;  %vm490_vm15 = vcmask 261120   ;;  %s1092_s17 = sshll.u32 %s2148_s9, 4  ;;  %s1093_s17 = int_to_ptr.hbm [resolvable:$true] %s1092_s17 }
  0x2e   :  { %167 = vmatmul.f32.vlgmr.msra.gmra.mxu0 %v139_v15  ;;  %227 = vmatmul.f32.vlgmr.msra.gmra.mxu3 %v142_v16  ;;  %v123_v23 = vld [vmem:[%s2141_s2 + $0x2b8] sm:$0xff]  ;;  %v122_v25 = vld [vmem:[%s2141_s2 + $0x2b0] sm:$0xff]  ;;  %v105_v26 = vld [vmem:[%s2141_s2 + $0x228] sm:$0xff] }
  0x2f   :  { %237 = vmatpush.msrb.mxu0 %v109_v17  ;;  %257 = vmatpush.msrb.mxu1 %v125_v18  ;;  %v121_v27 = vld [vmem:[%s2141_s2 + $0x2a8] sm:$0xff]  ;;  %v104_v28 = vld [vmem:[%s2141_s2 + $0x220] sm:$0xff]  ;;  %v103_v30 = vld [vmem:[%s2141_s2 + $0x218] sm:$0xff] }
  0x30   :  { %187 = vmatmul.f32.vlgmr.msra.gmra.mxu1 %v140_v19  ;;  %v120_v29 = vld [vmem:[%s2141_s2 + $0x2a0] sm:$0xff]  ;;  %v119_v31 = vld [vmem:[%s2141_s2 + $0x298] sm:$0xff]  ;;  %v102_v32 = vld [vmem:[%s2141_s2 + $0x210] sm:$0xff] }
  0x31   :  { %238 = vmatpush.msrb.mxu0 %v108_v20  ;;  %258 = vmatpush.msrb.mxu1 %v124_v21  ;;  %v118_v33 = vld [vmem:[%s2141_s2 + $0x290] sm:$0xff]  ;;  %v101_v34 = vld [vmem:[%s2141_s2 + $0x208] sm:$0xff]  ;;  %v100_v36 = vld [vmem:[%s2141_s2 + $0x200] sm:$0xff] }
  0x32   :  { %v117_v35 = vld [vmem:[%s2141_s2 + $0x288] sm:$0xff]  ;;  %v116_v37 = vld [vmem:[%s2141_s2 + $0x280] sm:$0xff]  ;;  %v143_v38 = vld.sshfl [vmem:[#allocation1 + $0x20] sm:$0xff pattern:$0x73625140] }
  0x33   :  { %239 = vmatpush.msrb.mxu0 %v107_v22  ;;  %259 = vmatpush.msrb.mxu1 %v123_v23  ;;  %v144_v39 = vld.sshfl [vmem:[#allocation1 + $0x28] sm:$0xff pattern:$0x73625140]  ;;  %v1122_v40 = vld [vmem:[%s2141_s2 + $0x300] ss:$0 sm:$0xff]  ;;  %v296_v47 = vld [vmem:[%s2142_s3 + $0x30] sm:$0xff] }
  0x34   :  { %v297_v45 = vld [vmem:[%s2142_s3 + $0x38] sm:$0xff]  ;;  %v295_v49 = vld [vmem:[%s2142_s3 + $0x28] sm:$0xff]  ;;  %v294_v51 = vld [vmem:[%s2142_s3 + $0x20] sm:$0xff] }
  0x35   :  { %240 = vmatpush.msrb.mxu0 %v106_v24  ;;  %260 = vmatpush.msrb.mxu1 %v122_v25  ;;  %v293_v53 = vld [vmem:[%s2142_s3 + $0x18] sm:$0xff]  ;;  %v292_v54 = vld [vmem:[%s2142_s3 + $0x10] sm:$0xff]  ;;  %v291_v58 = vld [vmem:[%s2142_s3 + $0x8] sm:$0xff] }
  0x36   :  { %312 = vmatpush.msrb.mxu3 %v297_v45  ;;  %v290_v60 = vld [vmem:[%s2142_s3] sm:$0xff]  ;;  %v350_v12 = vld [vmem:[%s2143_s4 + $0x38] sm:$0xff]  ;;  %v349_v13 = vld [vmem:[%s2143_s4 + $0x30] sm:$0xff] }
  0x37   :  { %241 = vmatpush.msrb.mxu0 %v105_v26  ;;  %261 = vmatpush.msrb.mxu1 %v121_v27  ;;  %v348_v14 = vld [vmem:[%s2143_s4 + $0x28] sm:$0xff]  ;;  %v347_v15 = vld [vmem:[%s2143_s4 + $0x20] sm:$0xff]  ;;  %v346_v16 = vld [vmem:[%s2143_s4 + $0x18] sm:$0xff] }
  0x38   :  { %313 = vmatpush.msrb.mxu3 %v296_v47  ;;  %v1123_v17 = vld [vmem:[%s2142_s3 + $0x40] ss:$0 sm:$0xff]  ;;  %v345_v18 = vld [vmem:[%s2143_s4 + $0x10] sm:$0xff]  ;;  %v344_v19 = vld [vmem:[%s2143_s4 + $0x8] sm:$0xff] }
  0x39   :  { %242 = vmatpush.msrb.mxu0 %v104_v28  ;;  %262 = vmatpush.msrb.mxu1 %v120_v29  ;;  %v343_v22 = vld [vmem:[%s2143_s4] sm:$0xff]  ;;  %v396_v45 = vld [vmem:[%s2144_s5 + $0x8] sm:$0xff] }
  0x3a   :  { %314 = vmatpush.msrb.mxu3 %v295_v49 }
  0x3b   :  { %243 = vmatpush.msrb.mxu0 %v103_v30  ;;  %263 = vmatpush.msrb.mxu1 %v119_v31 }
  0x3c   :  { %315 = vmatpush.msrb.mxu3 %v294_v51  ;;  %v437_v51 = vld [vmem:[%s2145_s6] sm:$0xff] }
  0x3d   :  { %244 = vmatpush.msrb.mxu0 %v102_v32  ;;  %264 = vmatpush.msrb.mxu1 %v118_v33 }
  0x3e   :  { %316 = vmatpush.msrb.mxu3 %v293_v53 }
  0x3f   :  { %245 = vmatpush.msrb.mxu0 %v101_v34  ;;  %265 = vmatpush.msrb.mxu1 %v117_v35 }
  0x40   :  { %317 = vmatpush.msrb.mxu3 %v292_v54 }
  0x41   :  { %246 = vmatpush.msrb.mxu0 %v100_v36  ;;  %266 = vmatpush.msrb.mxu1 %v116_v37 }
  0x42   :  { %247 = vmatmul.f32.vlgmr.msrb.gmra.mxu0 %v143_v38  ;;  %267 = vmatmul.f32.vlgmr.msrb.gmra.mxu1 %v144_v39  ;;  %v402_v38 = vld [vmem:[%s2144_s5 + $0x38] sm:$0xff]  ;;  %v401_v39 = vld [vmem:[%s2144_s5 + $0x30] sm:$0xff] }
  0x43   :  { %318 = vmatpush.msrb.mxu3 %v291_v58  ;;  %416 = vmatpush.msrb.mxu2 %v402_v38  ;;  %v583_v38 = vld [vmem:[%s2147_s8 + $0x208] sm:$0xff] }
  0x45   :  { %319 = vmatpush.msrb.mxu3 %v290_v60  ;;  %417 = vmatpush.msrb.mxu2 %v401_v39  ;;  %v582_v39 = vld [vmem:[%s2147_s8 + $0x200] sm:$0xff] }
  0x47   :  { %364 = vmatpush.msra.mxu3 %v350_v12 }
  0x49   :  { %365 = vmatpush.msra.mxu3 %v349_v13 }
  0x4b   :  { %366 = vmatpush.msra.mxu3 %v348_v14  ;;  %v466_v14 = vld [vmem:[%s2146_s7 + $0x8] sm:$0xff] }
  0x4d   :  { %367 = vmatpush.msra.mxu3 %v347_v15  ;;  %v465_v15 = vld [vmem:[%s2146_s7] sm:$0xff] }
  0x4f   :  { %368 = vmatpush.msra.mxu3 %v346_v16  ;;  %v663_v16 = vld [vmem:[%s2147_s8 + $0x488] sm:$0xff] }
  0x51   :  { %369 = vmatpush.msra.mxu3 %v345_v18  ;;  %v646_v18 = vld [vmem:[%s2147_s8 + $0x400] sm:$0xff] }
  0x53   :  { %370 = vmatpush.msra.mxu3 %v344_v19  ;;  %v654_v19 = vld [vmem:[%s2147_s8 + $0x440] sm:$0xff] }
  0x55   :  { %371 = vmatpush.msra.mxu3 %v343_v22  ;;  %v636_v22 = vld [vmem:[%s2147_s8 + $0x3b0] sm:$0xff] }
  0xab   :  { %v168_v41 = vpop.f32.mrf.mxu0 }
  0xac   :  { %v169_v42 = vadd.f32 %v1122_v40, %v168_v41  ;;  %v400_v40 = vld [vmem:[%s2144_s5 + $0x28] sm:$0xff]  ;;  %v399_v41 = vld [vmem:[%s2144_s5 + $0x20] sm:$0xff] }
  0xad   :  { %v188_v43 = vpop.f32.mrf.mxu1  ;;  %418 = vmatpush.msrb.mxu2 %v400_v40  ;;  %v653_v40 = vld [vmem:[%s2147_s8 + $0x438] sm:$0xff] }
  0xae   :  { %v189_v44 = vadd.f32 %v188_v43, %v169_v42  ;;  %v398_v42 = vld [vmem:[%s2144_s5 + $0x18] sm:$0xff]  ;;  %v1124_v43 = vld [vmem:[%s2143_s4 + $0x40] ss:$0 sm:$0xff]  ;;  %697 = vmatpush.msra.mxu1 %v653_v40 }
  0xaf   :  { %v208_v46 = vpop.f32.mrf.mxu2  ;;  %419 = vmatpush.msrb.mxu2 %v399_v41  ;;  %v574_v41 = vld [vmem:[%s2147_s8 + $0x1c0] sm:$0xff] }
  0xb0   :  { %v209_v48 = vadd.f32 %v208_v46, %v189_v44  ;;  %v397_v44 = vld [vmem:[%s2144_s5 + $0x10] sm:$0xff]  ;;  %v650_v40 = vld [vmem:[%s2147_s8 + $0x420] sm:$0xff] }
  0xb1   :  { %v228_v50 = vpop.f32.mrf.mxu3  ;;  %420 = vmatpush.msrb.mxu2 %v398_v42  ;;  %v573_v42 = vld [vmem:[%s2147_s8 + $0x1b8] sm:$0xff] }
  0xb2   :  { %v229_v52 = vadd.f32 %v228_v50, %v209_v48  ;;  %v395_v48 = vld [vmem:[%s2144_s5] sm:$0xff] }
  0xb3   :  { %421 = vmatpush.msrb.mxu2 %v397_v44  ;;  %v33_v50 = vld [vmem:[%s2139_s0] sm:$0x3]  ;;  %v565_v44 = vld [vmem:[%s2147_s8 + $0x178] sm:$0xff] }
  0xb5   :  { %422 = vmatpush.msrb.mxu2 %v396_v45  ;;  %v564_v45 = vld [vmem:[%s2147_s8 + $0x170] sm:$0xff] }
  0xb7   :  { %423 = vmatpush.msrb.mxu2 %v395_v48  ;;  %v555_v48 = vld [vmem:[%s2147_s8 + $0x128] sm:$0xff] }
  0xbf   :  { %v248_v55 = vpop.f32.mrf.mxu0  ;;  %v268_v56 = vpop.f32.mrf.mxu1 }
  0xc0   :  { %v249_v57 = vadd.f32 %v248_v55, %v229_v52  ;;  %v1167_v52 = vmov 0  }
  0xc1   :  { %1121 = vset.pattern.permute.xlu0 %v1167_v52  ;;  %v626_v52 = vld [vmem:[%s2147_s8 + $0x360] sm:$0xff] }
  0xc2   :  { %v269_v59 = vadd.f32 %v268_v56, %v249_v57  ;;  %433 = vperm.xlu0 %1121, %v33_v50   ;;  %v547_v50 = vld [vmem:[%s2147_s8 + $0xe8] sm:$0xff] }
  0xc4   :  { %v271_v61 = vsub.f32 0.0, %v269_v59 }
  0xc6   :  { %v272_v62 = vmul.f32 1.442695, %v271_v61 }
  0xc8   :  { %1129 = vpow2.f32 %v272_v62 }
  0xce   :  { %v1130_v63 = vpop.eup %1129 }
  0xcf   :  { %v274_v0 = vadd.f32 1.0, %v1130_v63 }
  0xd1   :  { %1131 = vrcp.f32 %v274_v0  ;;  %v286_v4 = vand.u32 2147483648, %v274_v0  ;;  %v284_v6 = vand.u32 2147483647, %v274_v0  ;;  %vm280_vm1 = vweird.f32 %v274_v0 }
  0xd3   :  { %v287_v8 = vor.u32 1.1754944e-38, %v286_v4  ;;  %vm285_vm3 = vcmp.eq.f32.partialorder %v284_v6, 8.507059e+37  ;;  %v469_v4 = vld [vmem:[%s2146_s7 + $0x20] sm:$0xff]  ;;  %v467_v6 = vld [vmem:[%s2146_s7 + $0x10] sm:$0xff] }
  0xd7   :  { %v1132_v1 = vpop.eup %1131 }
  0xd8   :  { %v276_v2 = vmul.f32 %v1132_v1, %v274_v0  ;;  %vm281_vm0 = vweird.f32 %v1132_v1 }
  0xd9   :  { %vm282_vm2 = vmor %vm280_vm1, %vm281_vm0  ;;  %vm1071_vm0 = vcmask 1041408   ;;  %vm1073_vm1 = vcmask 1045508  }
  0xda   :  { %v277_v3 = vsub.f32 1.0, %v276_v2 }
  0xdc   :  { %v278_v5 = vmul.f32 %v1132_v1, %v277_v3  ;;  %v662_v3 = vld [vmem:[%s2147_s8 + $0x480] sm:$0xff] }
  0xdd   :  { %732 = vmatpush.msra.mxu2 %v662_v3  ;;  %v657_v3 = vld [vmem:[%s2147_s8 + $0x458] sm:$0xff] }
  0xde   :  { %v279_v7 = vadd.f32 %v1132_v1, %v278_v5  ;;  %v468_v5 = vld [vmem:[%s2146_s7 + $0x18] sm:$0xff] }
  0xdf   :  { %506 = vmatpush.msra.mxu0 %v468_v5  ;;  %v599_v5 = vld [vmem:[%s2147_s8 + $0x288] sm:$0xff] }
  0xe0   :  { %v283_v9 = vsel %vm282_vm2, %v1132_v1, %v279_v7  ;;  %v428_v7 = vlaneseq  ;;  %vm1075_vm2 = vcmask 1043456  }
  0xe1   :  { %v288_v10 = vsel %vm285_vm3, %v287_v8, %v283_v9  ;;  %507 = vmatpush.msra.mxu0 %v467_v6  ;;  %v1125_v9 = vld [vmem:[%s2144_s5 + $0x40] ss:$0 sm:$0xff]  ;;  %v640_v6 = vld [vmem:[%s2147_s8 + $0x3d0] sm:$0xff] }
  0xe2   :  { %v289_v11 = vmul.f32 %v288_v10, %v269_v59  ;;  %v429_v8 = vand.u32 127, %v428_v7  ;;  %v648_v7 = vld [vmem:[%s2147_s8 + $0x410] sm:$0xff] }
  0xe3   :  { %508 = vmatpush.msra.mxu0 %v466_v14  ;;  %v581_v14 = vld [vmem:[%s2147_s8 + $0x1f8] sm:$0xff] }
  0xe4   :  { %1101 = vmatmul.msk.f32.vlgmr.msrb.gmra.mxu3 %vm300_vm4, %v289_v11  ;;  %vm430_vm13 = vcmp.eq.s32.totalorder %v429_v8, 7  ;;  %v602_v8 = vld [vmem:[%s2147_s8 + $0x2a0] sm:$0xff] }
  0xe5   :  { %459 = vmatpush.msrb.mxu3 %v437_v51  ;;  %509 = vmatpush.msra.mxu0 %v465_v15  ;;  %v546_v51 = vld [vmem:[%s2147_s8 + $0xe0] sm:$0xff] }
  0xe6   :  { %v622_v15 = vld [vmem:[%s2147_s8 + $0x340] sm:$0xff] }
  0xe7   :  { %772 = vmatpush.msrb.mxu0 %v663_v16  ;;  %v630_v16 = vld [vmem:[%s2147_s8 + $0x380] sm:$0xff] }
 0x134   :  { %v434_v11 = vpop.permute.xlu0 %433 }
 0x167   :  { %v321_v20 = vpop.f32.mrf.mxu3 }
 0x168   :  { %v322_v21 = vadd.f32 %v1123_v17, %v321_v20  ;;  %v655_v17 = vld [vmem:[%s2147_s8 + $0x448] sm:$0xff]  ;;  %v637_v20 = vld [vmem:[%s2147_s8 + $0x3b8] sm:$0xff] }
 0x16a   :  { %v324_v23 = vsub.f32 0.0, %v322_v21 }
 0x16c   :  { %v325_v24 = vmul.f32 1.442695, %v324_v23  ;;  %v628_v23 = vld [vmem:[%s2147_s8 + $0x370] sm:$0xff] }
 0x16e   :  { %1133 = vpow2.f32 %v325_v24  ;;  %v627_v24 = vld [vmem:[%s2147_s8 + $0x368] sm:$0xff] }
 0x174   :  { %v1134_v25 = vpop.eup %1133 }
 0x175   :  { %v327_v26 = vadd.f32 1.0, %v1134_v25  ;;  %v619_v25 = vld [vmem:[%s2147_s8 + $0x328] sm:$0xff] }
 0x177   :  { %1135 = vrcp.f32 %v327_v26  ;;  %v339_v30 = vand.u32 2147483648, %v327_v26  ;;  %v337_v32 = vand.u32 2147483647, %v327_v26  ;;  %vm333_vm6 = vweird.f32 %v327_v26 }
 0x179   :  { %v340_v34 = vor.u32 1.1754944e-38, %v339_v30  ;;  %vm338_vm8 = vcmp.eq.f32.partialorder %v337_v32, 8.507059e+37  ;;  %v601_v30 = vld [vmem:[%s2147_s8 + $0x298] sm:$0xff]  ;;  %v600_v32 = vld [vmem:[%s2147_s8 + $0x290] sm:$0xff] }
 0x17d   :  { %v1136_v27 = vpop.eup %1135 }
 0x17e   :  { %v329_v28 = vmul.f32 %v1136_v27, %v327_v26  ;;  %vm334_vm5 = vweird.f32 %v1136_v27  ;;  %v618_v26 = vld [vmem:[%s2147_s8 + $0x320] sm:$0xff] }
 0x17f   :  { %vm335_vm7 = vmor %vm333_vm6, %vm334_vm5 }
 0x180   :  { %v330_v29 = vsub.f32 1.0, %v329_v28  ;;  %v610_v28 = vld [vmem:[%s2147_s8 + $0x2e0] sm:$0xff] }
 0x182   :  { %v331_v31 = vmul.f32 %v1136_v27, %v330_v29  ;;  %v609_v29 = vld [vmem:[%s2147_s8 + $0x2d8] sm:$0xff] }
 0x184   :  { %v332_v33 = vadd.f32 %v1136_v27, %v331_v31 }
 0x186   :  { %v336_v35 = vsel %vm335_vm7, %v1136_v27, %v332_v33  ;;  %v1126_v27 = vld [vmem:[%s2145_s6 + $0x8] ss:$0 sm:$0xff] }
 0x187   :  { %v341_v36 = vsel %vm338_vm8, %v340_v34, %v336_v35  ;;  %v592_v34 = vld [vmem:[%s2147_s8 + $0x250] sm:$0xff]  ;;  %v591_v35 = vld [vmem:[%s2147_s8 + $0x248] sm:$0xff] }
 0x188   :  { %v342_v37 = vmul.f32 %v341_v36, %v322_v21  ;;  %v645_v21 = vld [vmem:[%s2147_s8 + $0x3f8] sm:$0xff] }
 0x18a   :  { %1102 = vmatmul.msk.f32.vlgmr.msra.gmra.mxu3 %vm300_vm4, %v342_v37  ;;  %v664_v37 = vld [vmem:[%s2147_s8 + $0x490] sm:$0xff] }
 0x18b   :  { %485 = vmatpush.msra.mxu3 %v469_v4  ;;  %v611_v4 = vld [vmem:[%s2147_s8 + $0x2e8] sm:$0xff] }
 0x20d   :  { %v373_v46 = vpop.f32.mrf.mxu3 }
 0x20e   :  { %v374_v47 = vadd.f32 %v1124_v43, %v373_v46  ;;  %v644_v43 = vld [vmem:[%s2147_s8 + $0x3f0] sm:$0xff]  ;;  %v635_v46 = vld [vmem:[%s2147_s8 + $0x3a8] sm:$0xff] }
 0x20f   :  { %698 = vmatpush.msra.mxu1 %v644_v43  ;;  %v623_v43 = vld [vmem:[%s2147_s8 + $0x348] sm:$0xff] }
 0x210   :  { %v376_v49 = vsub.f32 0.0, %v374_v47 }
 0x211   :  { %699 = vmatpush.msra.mxu1 %v635_v46  ;;  %v596_v46 = vld [vmem:[%s2147_s8 + $0x270] sm:$0xff] }
 0x212   :  { %v377_v53 = vmul.f32 1.442695, %v376_v49  ;;  %v656_v49 = vld [vmem:[%s2147_s8 + $0x450] sm:$0xff] }
 0x213   :  { %700 = vmatpush.msra.mxu1 %v626_v52  ;;  %v576_v52 = vld [vmem:[%s2147_s8 + $0x1d0] sm:$0xff] }
 0x214   :  { %1137 = vpow2.f32 %v377_v53  ;;  %v647_v53 = vld [vmem:[%s2147_s8 + $0x408] sm:$0xff] }
 0x21a   :  { %v1138_v54 = vpop.eup %1137 }
 0x21b   :  { %v379_v55 = vadd.f32 1.0, %v1138_v54  ;;  %v538_v54 = vld [vmem:[%s2147_s8 + $0xa0] sm:$0xff] }
 0x21d   :  { %1139 = vrcp.f32 %v379_v55  ;;  %v391_v59 = vand.u32 2147483648, %v379_v55  ;;  %v389_v61 = vand.u32 2147483647, %v379_v55  ;;  %vm385_vm10 = vweird.f32 %v379_v55 }
 0x21f   :  { %v392_v63 = vor.u32 1.1754944e-38, %v391_v59  ;;  %vm390_vm12 = vcmp.eq.f32.partialorder %v389_v61, 8.507059e+37  ;;  %v528_v59 = vld [vmem:[%s2147_s8 + $0x50] sm:$0xff]  ;;  %v629_v61 = vld [vmem:[%s2147_s8 + $0x378] sm:$0xff] }
 0x223   :  { %v1140_v56 = vpop.eup %1139 }
 0x224   :  { %v381_v57 = vmul.f32 %v1140_v56, %v379_v55  ;;  %vm386_vm9 = vweird.f32 %v1140_v56  ;;  %v537_v55 = vld [vmem:[%s2147_s8 + $0x98] sm:$0xff] }
 0x225   :  { %vm387_vm11 = vmor %vm385_vm10, %vm386_vm9 }
 0x226   :  { %v382_v58 = vsub.f32 1.0, %v381_v57  ;;  %v638_v57 = vld [vmem:[%s2147_s8 + $0x3c0] sm:$0xff] }
 0x228   :  { %v383_v60 = vmul.f32 %v1140_v56, %v382_v58  ;;  %v529_v58 = vld [vmem:[%s2147_s8 + $0x58] sm:$0xff] }
 0x22a   :  { %v384_v62 = vadd.f32 %v1140_v56, %v383_v60  ;;  %v608_v60 = vld [vmem:[%s2147_s8 + $0x2d0] sm:$0xff] }
 0x22c   :  { %v388_v0 = vsel %vm387_vm11, %v1140_v56, %v384_v62  ;;  %v617_v56 = vld [vmem:[%s2147_s8 + $0x318] sm:$0xff]  ;;  %v520_v62 = vld [vmem:[%s2147_s8 + $0x10] sm:$0xff] }
 0x22d   :  { %v393_v1 = vsel %vm390_vm12, %v392_v63, %v388_v0  ;;  %701 = vmatpush.msra.mxu1 %v617_v56  ;;  %v658_v63 = vld [vmem:[%s2147_s8 + $0x460] sm:$0xff]  ;;  %v620_v0 = vld [vmem:[%s2147_s8 + $0x330] sm:$0xff]  ;;  %v567_v56 = vld [vmem:[%s2147_s8 + $0x188] sm:$0xff] }
 0x22e   :  { %v394_v2 = vmul.f32 %v393_v1, %v374_v47  ;;  %v556_v47 = vld [vmem:[%s2147_s8 + $0x130] sm:$0xff]  ;;  %v519_v1 = vld [vmem:[%s2147_s8 + $0x8] sm:$0xff] }
 0x22f   :  { %702 = vmatpush.msra.mxu1 %v608_v60  ;;  %v558_v60 = vld [vmem:[%s2147_s8 + $0x140] sm:$0xff] }
 0x230   :  { %1103 = vmatmul.msk.f32.vlgmr.msrb.gmra.mxu2 %vm300_vm4, %v394_v2  ;;  %v649_v2 = vld [vmem:[%s2147_s8 + $0x418] sm:$0xff] }
 0x231   :  { %777 = vmatpush.msrb.mxu2 %v655_v17  ;;  %703 = vmatpush.msra.mxu1 %v599_v5  ;;  %v584_v17 = vld [vmem:[%s2147_s8 + $0x210] sm:$0xff]  ;;  %v533_v5 = vld [vmem:[%s2147_s8 + $0x78] sm:$0xff] }
 0x233   :  { %778 = vmatpush.msrb.mxu2 %v646_v18  ;;  %v572_v18 = vld [vmem:[%s2147_s8 + $0x1b0] sm:$0xff] }
 0x235   :  { %779 = vmatpush.msrb.mxu2 %v637_v20  ;;  %v621_v20 = vld [vmem:[%s2147_s8 + $0x338] sm:$0xff] }
 0x237   :  { %780 = vmatpush.msrb.mxu2 %v628_v23  ;;  %v604_v23 = vld [vmem:[%s2147_s8 + $0x2b0] sm:$0xff] }
 0x239   :  { %781 = vmatpush.msrb.mxu2 %v619_v25  ;;  %v566_v25 = vld [vmem:[%s2147_s8 + $0x180] sm:$0xff] }
 0x23b   :  { %782 = vmatpush.msrb.mxu2 %v610_v28  ;;  %v603_v28 = vld [vmem:[%s2147_s8 + $0x2a8] sm:$0xff] }
 0x23d   :  { %783 = vmatpush.msrb.mxu2 %v601_v30  ;;  %v586_v30 = vld [vmem:[%s2147_s8 + $0x220] sm:$0xff] }
 0x23f   :  { %784 = vmatpush.msrb.mxu2 %v592_v34  ;;  %v539_v34 = vld [vmem:[%s2147_s8 + $0xa8] sm:$0xff] }
 0x241   :  { %785 = vmatpush.msrb.mxu2 %v583_v38  ;;  %v521_v38 = vld [vmem:[%s2147_s8 + $0x18] sm:$0xff] }
 0x243   :  { %786 = vmatpush.msrb.mxu2 %v574_v41  ;;  %v641_v41 = vld [vmem:[%s2147_s8 + $0x3d8] sm:$0xff] }
 0x245   :  { %787 = vmatpush.msrb.mxu2 %v565_v44  ;;  %v614_v44 = vld [vmem:[%s2147_s8 + $0x300] sm:$0xff] }
 0x247   :  { %788 = vmatpush.msrb.mxu2 %v556_v47  ;;  %v545_v47 = vld [vmem:[%s2147_s8 + $0xd8] sm:$0xff] }
 0x249   :  { %789 = vmatpush.msrb.mxu2 %v547_v50  ;;  %v587_v50 = vld [vmem:[%s2147_s8 + $0x228] sm:$0xff] }
 0x24b   :  { %790 = vmatpush.msrb.mxu2 %v538_v54  ;;  %v578_v54 = vld [vmem:[%s2147_s8 + $0x1e0] sm:$0xff] }
 0x24d   :  { %791 = vmatpush.msrb.mxu2 %v529_v58  ;;  %v569_v58 = vld [vmem:[%s2147_s8 + $0x198] sm:$0xff] }
 0x24f   :  { %792 = vmatpush.msrb.mxu2 %v520_v62  ;;  %v560_v62 = vld [vmem:[%s2147_s8 + $0x150] sm:$0xff] }
 0x2b3   :  { %v425_v10 = vpop.f32.mrf.mxu2 }
 0x2b4   :  { %v426_v12 = vadd.f32 %v1125_v9, %v425_v10  ;;  %v590_v9 = vld [vmem:[%s2147_s8 + $0x240] sm:$0xff]  ;;  %v631_v10 = vld [vmem:[%s2147_s8 + $0x388] sm:$0xff] }
 0x2b5   :  { %704 = vmatpush.msra.mxu1 %v590_v9 }
 0x2b6   :  { %v1618_v13 = vsel %vm430_vm13, %v434_v11, %v426_v12  ;;  %v639_v11 = vld [vmem:[%s2147_s8 + $0x3c8] sm:$0xff]  ;;  %v593_v12 = vld [vmem:[%s2147_s8 + $0x258] sm:$0xff] }
 0x2b7   :  { %1104 = vmatmul.msk.f32.vlgmr.msrb.gmra.mxu3 %vm440_vm14, %v1618_v13  ;;  %1110 = vmatmul.msk.f32.vlgmr.msra.gmra.mxu2 %vm440_vm14, %v1618_v13 }
 0x2b8   :  { %737 = vmatpush.msrb.mxu3 %v654_v19  ;;  %897 = vmatpush.msra.mxu2 %v658_v63  ;;  %v613_v19 = vld [vmem:[%s2147_s8 + $0x2f8] sm:$0xff] }
 0x2b9   :  { %705 = vmatpush.msra.mxu1 %v581_v14  ;;  %v665_v63 = vld [vmem:[%s2147_s8 + $0x498] sm:$0xff] }
 0x2ba   :  { %738 = vmatpush.msrb.mxu3 %v645_v21  ;;  %898 = vmatpush.msra.mxu2 %v649_v2  ;;  %v575_v21 = vld [vmem:[%s2147_s8 + $0x1c8] sm:$0xff]  ;;  %v540_v2 = vld [vmem:[%s2147_s8 + $0xb0] sm:$0xff] }
 0x2bb   :  { %706 = vmatpush.msra.mxu1 %v572_v18  ;;  %v652_v18 = vld [vmem:[%s2147_s8 + $0x430] sm:$0xff] }
 0x2bc   :  { %739 = vmatpush.msrb.mxu3 %v636_v22  ;;  %899 = vmatpush.msra.mxu2 %v640_v6  ;;  %v563_v22 = vld [vmem:[%s2147_s8 + $0x168] sm:$0xff]  ;;  %v522_v6 = vld [vmem:[%s2147_s8 + $0x20] sm:$0xff] }
 0x2bd   :  { %707 = vmatpush.msra.mxu1 %v563_v22  ;;  %v667_v22 = vld [vmem:[%s2147_s8 + $0x4a8] sm:$0xff] }
 0x2be   :  { %740 = vmatpush.msrb.mxu3 %v627_v24  ;;  %900 = vmatpush.msra.mxu2 %v631_v10  ;;  %v612_v24 = vld [vmem:[%s2147_s8 + $0x2f0] sm:$0xff] }
 0x2bf   :  { %1105 = vmatmul.msk.f32.vlgmr.msra.gmra.mxu3 %vm440_vm14, %v1618_v13 }
 0x2c0   :  { %741 = vmatpush.msrb.mxu3 %v618_v26  ;;  %901 = vmatpush.msra.mxu2 %v622_v15  ;;  %v554_v26 = vld [vmem:[%s2147_s8 + $0x120] sm:$0xff]  ;;  %v661_v15 = vld [vmem:[%s2147_s8 + $0x478] sm:$0xff] }
 0x2c1   :  { %708 = vmatpush.msra.mxu1 %v554_v26  ;;  %v598_v26 = vld [vmem:[%s2147_s8 + $0x280] sm:$0xff] }
 0x2c2   :  { %742 = vmatpush.msrb.mxu3 %v609_v29  ;;  %902 = vmatpush.msra.mxu2 %v613_v19  ;;  %v557_v29 = vld [vmem:[%s2147_s8 + $0x138] sm:$0xff]  ;;  %v643_v19 = vld [vmem:[%s2147_s8 + $0x3e8] sm:$0xff] }
 0x2c3   :  { %709 = vmatpush.msra.mxu1 %v545_v47  ;;  %v552_v47 = vld [vmem:[%s2147_s8 + $0x110] sm:$0xff] }
 0x2c4   :  { %743 = vmatpush.msrb.mxu3 %v600_v32  ;;  %903 = vmatpush.msra.mxu2 %v604_v23  ;;  %v548_v32 = vld [vmem:[%s2147_s8 + $0xf0] sm:$0xff]  ;;  %v670_v23 = vld [vmem:[%s2147_s8 + $0x4c0] sm:$0xff] }
 0x2c6   :  { %744 = vmatpush.msrb.mxu3 %v591_v35  ;;  %v568_v35 = vld [vmem:[%s2147_s8 + $0x190] sm:$0xff] }
 0x2c8   :  { %745 = vmatpush.msrb.mxu3 %v582_v39  ;;  %v659_v39 = vld [vmem:[%s2147_s8 + $0x468] sm:$0xff] }
 0x2ca   :  { %746 = vmatpush.msrb.mxu3 %v573_v42  ;;  %v632_v42 = vld [vmem:[%s2147_s8 + $0x390] sm:$0xff] }
 0x2cc   :  { %747 = vmatpush.msrb.mxu3 %v564_v45  ;;  %v605_v45 = vld [vmem:[%s2147_s8 + $0x2b8] sm:$0xff] }
 0x2ce   :  { %748 = vmatpush.msrb.mxu3 %v555_v48  ;;  %v585_v48 = vld [vmem:[%s2147_s8 + $0x218] sm:$0xff] }
 0x2d0   :  { %749 = vmatpush.msrb.mxu3 %v546_v51  ;;  %v536_v51 = vld [vmem:[%s2147_s8 + $0x90] sm:$0xff] }
 0x2d1   :  { %710 = vmatpush.msra.mxu1 %v536_v51 }
 0x2d2   :  { %750 = vmatpush.msrb.mxu3 %v537_v55  ;;  %v527_v55 = vld [vmem:[%s2147_s8 + $0x48] sm:$0xff] }
 0x2d3   :  { %711 = vmatpush.msra.mxu1 %v527_v55 }
 0x2d4   :  { %751 = vmatpush.msrb.mxu3 %v528_v59  ;;  %v518_v59 = vld [vmem:[%s2147_s8] sm:$0xff] }
 0x2d5   :  { %712 = vmatpush.msra.mxu1 %v518_v59 }
 0x2d6   :  { %752 = vmatpush.msrb.mxu3 %v519_v1  ;;  %v551_v1 = vld [vmem:[%s2147_s8 + $0x108] sm:$0xff] }
 0x2d7   :  { %852 = vmatpush.msrb.mxu1 %v665_v63 }
 0x2d8   :  { %857 = vmatpush.msra.mxu3 %v657_v3  ;;  %v542_v3 = vld [vmem:[%s2147_s8 + $0xc0] sm:$0xff] }
 0x2da   :  { %858 = vmatpush.msra.mxu3 %v648_v7  ;;  %v524_v7 = vld [vmem:[%s2147_s8 + $0x30] sm:$0xff] }
 0x2dc   :  { %859 = vmatpush.msra.mxu3 %v639_v11 }
 0x2de   :  { %860 = vmatpush.msra.mxu3 %v630_v16  ;;  %v666_v16 = vld [vmem:[%s2147_s8 + $0x4a0] sm:$0xff] }
 0x2e0   :  { %861 = vmatpush.msra.mxu3 %v621_v20  ;;  %v634_v20 = vld [vmem:[%s2147_s8 + $0x3a0] sm:$0xff] }
 0x2e2   :  { %862 = vmatpush.msra.mxu3 %v612_v24  ;;  %v616_v24 = vld [vmem:[%s2147_s8 + $0x310] sm:$0xff] }
 0x2e4   :  { %863 = vmatpush.msra.mxu3 %v603_v28  ;;  %v589_v28 = vld [vmem:[%s2147_s8 + $0x238] sm:$0xff] }
 0x33a   :  { %v461_v31 = vpop.f32.mrf.mxu3  ;;  %v734_v55 = vpop.f32.mrf.mxu2 }
 0x33b   :  { %v462_v33 = vadd.f32 %v1126_v27, %v461_v31  ;;  %v595_v27 = vld [vmem:[%s2147_s8 + $0x268] sm:$0xff]  ;;  %v594_v31 = vld [vmem:[%s2147_s8 + $0x260] sm:$0xff] }
 0x33c   :  { %904 = vmatpush.msra.mxu2 %v595_v27  ;;  %864 = vmatpush.msra.mxu3 %v594_v31  ;;  %v668_v27 = vld [vmem:[%s2147_s8 + $0x4b0] sm:$0xff]  ;;  %v562_v31 = vld [vmem:[%s2147_s8 + $0x160] sm:$0xff] }
 0x33d   :  { %v464_v36 = vmax.f32 %v462_v33, 0.0  ;;  %v577_v33 = vld [vmem:[%s2147_s8 + $0x1d8] sm:$0xff] }
 0x33e   :  { %905 = vmatpush.msra.mxu2 %v586_v30  ;;  %865 = vmatpush.msra.mxu3 %v585_v48  ;;  %v571_v30 = vld [vmem:[%s2147_s8 + $0x1a8] sm:$0xff] }
 0x33f   :  { %1106 = vmatmul.msk.f32.vlgmr.msra.gmra.mxu0 %vm490_vm15, %v464_v36  ;;  %v530_v36 = vld [vmem:[%s2147_s8 + $0x60] sm:$0xff]  ;;  %v543_v48 = vld [vmem:[%s2147_s8 + $0xc8] sm:$0xff] }
 0x340   :  { %812 = vmatpush.msra.mxu0 %v664_v37  ;;  %906 = vmatpush.msra.mxu2 %v577_v33  ;;  %v559_v37 = vld [vmem:[%s2147_s8 + $0x148] sm:$0xff]  ;;  %v553_v33 = vld [vmem:[%s2147_s8 + $0x118] sm:$0xff] }
 0x341   :  { %866 = vmatpush.msra.mxu3 %v576_v52 }
 0x342   :  { %907 = vmatpush.msra.mxu2 %v568_v35  ;;  %v487_v9 = vpop.f32.mrf.mxu3  ;;  %v544_v35 = vld [vmem:[%s2147_s8 + $0xd0] sm:$0xff] }
 0x343   :  { %867 = vmatpush.msra.mxu3 %v567_v56 }
 0x344   :  { %908 = vmatpush.msra.mxu2 %v559_v37  ;;  %v535_v37 = vld [vmem:[%s2147_s8 + $0x88] sm:$0xff] }
 0x345   :  { %868 = vmatpush.msra.mxu3 %v558_v60 }
 0x347   :  { %1111 = vmatmul.msk.f32.vlgmr.msrb.gmra.mxu0 %vm440_vm14, %v1618_v13 }
 0x348   :  { %817 = vmatpush.msrb.mxu0 %v656_v49  ;;  %v550_v49 = vld [vmem:[%s2147_s8 + $0x100] sm:$0xff] }
 0x349   :  { %909 = vmatpush.msra.mxu2 %v550_v49  ;;  %v534_v49 = vld [vmem:[%s2147_s8 + $0x80] sm:$0xff] }
 0x34a   :  { %818 = vmatpush.msrb.mxu0 %v647_v53  ;;  %v541_v53 = vld [vmem:[%s2147_s8 + $0xb8] sm:$0xff] }
 0x34b   :  { %910 = vmatpush.msra.mxu2 %v541_v53  ;;  %v1107_v53 = vld [vmem:[%s2147_s8 + $0x4c8] ss:$8 sm:$0xf] }
 0x34c   :  { %819 = vmatpush.msrb.mxu0 %v638_v57  ;;  %v532_v57 = vld [vmem:[%s2147_s8 + $0x70] sm:$0xff] }
 0x34d   :  { %911 = vmatpush.msra.mxu2 %v532_v57 }
 0x34e   :  { %820 = vmatpush.msrb.mxu0 %v629_v61  ;;  %v523_v61 = vld [vmem:[%s2147_s8 + $0x28] sm:$0xff] }
 0x34f   :  { %1112 = vmatmul.msk.f32.vlgmr.msra.gmra.mxu0 %vm440_vm14, %v1618_v13  ;;  %912 = vmatpush.msra.mxu2 %v523_v61 }
 0x350   :  { %821 = vmatpush.msrb.mxu0 %v620_v0  ;;  %v549_v0 = vld [vmem:[%s2147_s8 + $0xf8] sm:$0xff] }
 0x351   :  { %869 = vmatpush.msra.mxu3 %v549_v0 }
 0x352   :  { %822 = vmatpush.msrb.mxu0 %v611_v4  ;;  %v531_v4 = vld [vmem:[%s2147_s8 + $0x68] sm:$0xff] }
 0x353   :  { %870 = vmatpush.msra.mxu3 %v540_v2 }
 0x354   :  { %823 = vmatpush.msrb.mxu0 %v602_v8  ;;  %v1127_v8 = vld [vmem:[%s2146_s7 + $0x28] ss:$0 sm:$0xff] }
 0x355   :  { %871 = vmatpush.msra.mxu3 %v531_v4 }
 0x356   :  { %824 = vmatpush.msrb.mxu0 %v593_v12 }
 0x357   :  { %872 = vmatpush.msra.mxu3 %v522_v6 }
 0x358   :  { %825 = vmatpush.msrb.mxu0 %v584_v17  ;;  %v669_v17 = vld [vmem:[%s2147_s8 + $0x4b8] sm:$0xff] }
 0x35a   :  { %826 = vmatpush.msrb.mxu0 %v575_v21  ;;  %v625_v21 = vld [vmem:[%s2147_s8 + $0x358] sm:$0xff] }
 0x35c   :  { %827 = vmatpush.msrb.mxu0 %v566_v25  ;;  %v607_v25 = vld [vmem:[%s2147_s8 + $0x2c8] sm:$0xff] }
 0x35e   :  { %828 = vmatpush.msrb.mxu0 %v557_v29  ;;  %v580_v29 = vld [vmem:[%s2147_s8 + $0x1f0] sm:$0xff] }
 0x360   :  { %829 = vmatpush.msrb.mxu0 %v548_v32  ;;  %v660_v32 = vld [vmem:[%s2147_s8 + $0x470] sm:$0xff] }
 0x362   :  { %830 = vmatpush.msrb.mxu0 %v539_v34  ;;  %v651_v34 = vld [vmem:[%s2147_s8 + $0x428] sm:$0xff] }
 0x364   :  { %831 = vmatpush.msrb.mxu0 %v530_v36  ;;  %v642_v36 = vld [vmem:[%s2147_s8 + $0x3e0] sm:$0xff] }
 0x366   :  { %832 = vmatpush.msrb.mxu0 %v521_v38  ;;  %v633_v38 = vld [vmem:[%s2147_s8 + $0x398] sm:$0xff] }
 0x368   :  { %937 = vmatpush.msra.mxu0 %v659_v39  ;;  %v526_v39 = vld [vmem:[%s2147_s8 + $0x40] sm:$0xff] }
 0x36a   :  { %938 = vmatpush.msra.mxu0 %v650_v40  ;;  %v624_v40 = vld [vmem:[%s2147_s8 + $0x350] sm:$0xff] }
 0x36c   :  { %939 = vmatpush.msra.mxu0 %v641_v41  ;;  %v615_v41 = vld [vmem:[%s2147_s8 + $0x308] sm:$0xff] }
 0x36e   :  { %940 = vmatpush.msra.mxu0 %v632_v42  ;;  %v606_v42 = vld [vmem:[%s2147_s8 + $0x2c0] sm:$0xff] }
 0x370   :  { %941 = vmatpush.msra.mxu0 %v623_v43  ;;  %v597_v43 = vld [vmem:[%s2147_s8 + $0x278] sm:$0xff] }
 0x372   :  { %942 = vmatpush.msra.mxu0 %v614_v44  ;;  %v579_v44 = vld [vmem:[%s2147_s8 + $0x1e8] sm:$0xff] }
 0x374   :  { %943 = vmatpush.msra.mxu0 %v605_v45  ;;  %v570_v45 = vld [vmem:[%s2147_s8 + $0x1a0] sm:$0xff] }
 0x376   :  { %944 = vmatpush.msra.mxu0 %v596_v46  ;;  %v561_v46 = vld [vmem:[%s2147_s8 + $0x158] sm:$0xff] }
 0x378   :  { %945 = vmatpush.msra.mxu0 %v587_v50  ;;  %v525_v50 = vld [vmem:[%s2147_s8 + $0x38] sm:$0xff] }
 0x37a   :  { %946 = vmatpush.msra.mxu0 %v578_v54  ;;  %v1108_v54 = vld [vmem:[%s2147_s8 + $0x4c8] ss:$8 sm:$0xf0] }
 0x37b   :  { %v674_v56 = vor.u32 %v1108_v54, %v1107_v53 }
 0x37c   :  { %947 = vmatpush.msra.mxu0 %v569_v58 }
 0x37d   :  { %v679_v58 = vperm.slane %v674_v56, 0  ;;  %v682_v59 = vperm.slane %v674_v56, 3  ;;  %v680_v60 = vperm.slane %v674_v56, 1 }
 0x37e   :  { %948 = vmatpush.msra.mxu0 %v560_v62  ;;  %v681_v62 = vperm.slane %v674_v56, 2 }
 0x380   :  { %949 = vmatpush.msra.mxu0 %v551_v1 }
 0x382   :  { %950 = vmatpush.msra.mxu0 %v542_v3 }
 0x384   :  { %951 = vmatpush.msra.mxu0 %v533_v5 }
 0x386   :  { %952 = vmatpush.msra.mxu0 %v524_v7 }
 0x3bc   :  { %v511_v10 = vpop.f32.mrf.mxu0 }
 0x3bd   :  { %v512_v11 = vadd.f32 %v511_v10, %v487_v9 }
 0x3bf   :  { %v516_v12 = vadd.f32 %v1127_v8, %v512_v11 }
 0x3c1   :  { %v1987_v14 = vmax.f32 %v516_v12, 0.0 }
 0x3c3   :  { %713 = vmatmul.f32.vlgmr.msra.gmra.mxu1 %v1987_v14  ;;  %753 = vmatmul.f32.vlgmr.msrb.gmra.mxu3 %v1987_v14 }
 0x3c4   :  { %793 = vmatmul.f32.vlgmr.msrb.gmra.mxu2 %v1987_v14  ;;  %833 = vmatmul.f32.vlgmr.msrb.gmra.mxu0 %v1987_v14  ;;  %v774_v51 = vpop.f32.mrf.mxu0 }
 0x3c5   :  { %1017 = vmatpush.msrb.mxu2 %v661_v15  ;;  %892 = vmatpush.msra.mxu1 %v666_v16 }
 0x3c6   :  { %1012 = vmatpush.msrb.mxu3 %v669_v17 }
 0x3c7   :  { %1018 = vmatpush.msrb.mxu2 %v652_v18 }
 0x3c9   :  { %1019 = vmatpush.msrb.mxu2 %v643_v19 }
 0x3cb   :  { %1020 = vmatpush.msrb.mxu2 %v634_v20  ;;  %1113 = vmatmul.msk.f32.vlgmr.msrb.gmra.mxu1 %vm440_vm14, %v1618_v13 }
 0x3cc   :  { %873 = vmatmul.f32.vlgmr.msra.gmra.mxu3 %v1987_v14  ;;  %913 = vmatmul.f32.vlgmr.msra.gmra.mxu2 %v1987_v14  ;;  %v814_v52 = vpop.f32.mrf.mxu0 }
 0x3cd   :  { %953 = vmatmul.f32.vlgmr.msra.gmra.mxu0 %v1987_v14  ;;  %1021 = vmatpush.msrb.mxu2 %v625_v21  ;;  %v1128_v21 = vld [vmem:[%s2147_s8 + $0x508] ss:$0 sm:$0xff] }
 0x3ce   :  { %932 = vmatpush.msrb.mxu1 %v667_v22  ;;  %1052 = vmatpush.msra.mxu3 %v670_v23 }
 0x3cf   :  { %1022 = vmatpush.msrb.mxu2 %v616_v24 }
 0x3d1   :  { %1023 = vmatpush.msrb.mxu2 %v607_v25 }
 0x3d3   :  { %1024 = vmatpush.msrb.mxu2 %v598_v26  ;;  %1114 = vmatmul.msk.f32.vlgmr.msra.gmra.mxu1 %vm440_vm14, %v1618_v13 }
 0x3d4   :  { %1117 = vmatmul.msk.f32.vlgmr.msrb.gmra.mxu3 %vm440_vm14, %v1618_v13  ;;  %972 = vmatpush.msra.mxu1 %v668_v27 }
 0x3d5   :  { %1025 = vmatpush.msrb.mxu2 %v589_v28  ;;  %v684_v28 = vperm.slane %v674_v56, 5 }
 0x3d7   :  { %1026 = vmatpush.msrb.mxu2 %v580_v29  ;;  %v685_v29 = vperm.slane %v674_v56, 6 }
 0x3d9   :  { %1027 = vmatpush.msrb.mxu2 %v571_v30 }
 0x3db   :  { %1028 = vmatpush.msrb.mxu2 %v562_v31  ;;  %1115 = vmatmul.msk.f32.vlgmr.msrb.gmra.mxu1 %vm440_vm14, %v1618_v13  ;;  %v683_v31 = vperm.slane %v674_v56, 4 }
 0x3dc   :  { %977 = vmatpush.msrb.mxu1 %v660_v32  ;;  %1118 = vmatmul.msk.f32.vlgmr.msra.gmra.mxu3 %vm440_vm14, %v1618_v13 }
 0x3dd   :  { %1029 = vmatpush.msrb.mxu2 %v553_v33  ;;  %v686_v33 = vperm.slane %v674_v56, 7 }
 0x3de   :  { %978 = vmatpush.msrb.mxu1 %v651_v34 }
 0x3df   :  { %1030 = vmatpush.msrb.mxu2 %v544_v35 }
 0x3e0   :  { %979 = vmatpush.msrb.mxu1 %v642_v36 }
 0x3e1   :  { %1031 = vmatpush.msrb.mxu2 %v535_v37 }
 0x3e2   :  { %980 = vmatpush.msrb.mxu1 %v633_v38 }
 0x3e3   :  { %1032 = vmatpush.msrb.mxu2 %v526_v39  ;;  %1116 = vmatmul.msk.f32.vlgmr.msra.gmra.mxu1 %vm440_vm14, %v1618_v13  ;;  %v588_v13 = vld [vmem:[%s2147_s8 + $0x230] sm:$0xff]  ;;  %s1168_s8 = smov [#allocation2]  }
 0x3e4   :  { %1033 = vmatmul.f32.vlgmr.msrb.gmra.mxu2 %v1987_v14  ;;  %981 = vmatpush.msrb.mxu1 %v624_v40  ;;  %s1090_s15 = sshll.u32 %s1168_s8, 4  ;;  %s1091_s15 = int_to_ptr.vmem [resolvable:$true] %s1090_s15 }
 0x3e6   :  { %982 = vmatpush.msrb.mxu1 %v615_v41 }
 0x3e8   :  { %983 = vmatpush.msrb.mxu1 %v606_v42 }
 0x3ea   :  { %984 = vmatpush.msrb.mxu1 %v597_v43 }
 0x3ec   :  { %985 = vmatpush.msrb.mxu1 %v588_v13 }
 0x3ee   :  { %986 = vmatpush.msrb.mxu1 %v579_v44 }
 0x3f0   :  { %987 = vmatpush.msrb.mxu1 %v570_v45 }
 0x3f2   :  { %988 = vmatpush.msrb.mxu1 %v561_v46 }
 0x3f4   :  { %989 = vmatpush.msrb.mxu1 %v552_v47 }
 0x3f6   :  { %990 = vmatpush.msrb.mxu1 %v543_v48 }
 0x3f8   :  { %991 = vmatpush.msrb.mxu1 %v534_v49 }
 0x3fa   :  { %992 = vmatpush.msrb.mxu1 %v525_v50 }
 0x3fb   :  { %993 = vmatmul.f32.vlgmr.msrb.gmra.mxu1 %v1987_v14 }
 0x440   :  { %v714_v57 = vpop.f32.mrf.mxu1 }
 0x441   :  { %v834_v61 = vpop.f32.mrf.mxu0  ;;  %v715_v0 = vadd.f32 %v714_v57, %v679_v58 }
 0x442   :  { %v835_v1 = vadd.f32 %v834_v61, %v682_v59 }
 0x443   :  { %v735_v9 = vadd.f32 %v734_v55, %v715_v0 }
 0x446   :  { %v754_v63 = vpop.f32.mrf.mxu3 }
 0x447   :  { %v755_v2 = vadd.f32 %v754_v63, %v680_v60  ;;  %v794_v3 = vpop.f32.mrf.mxu2 }
 0x448   :  { %v795_v4 = vadd.f32 %v794_v3, %v681_v62  ;;  %v854_v5 = vpop.f32.mrf.mxu1 }
 0x449   :  { %v775_v6 = vadd.f32 %v774_v51, %v755_v2  ;;  %v855_v7 = vadd.f32 %v854_v5, %v835_v1 }
 0x44a   :  { %v815_v8 = vadd.f32 %v814_v52, %v795_v4  ;;  %v954_v30 = vpop.f32.mrf.mxu0 }
 0x44b   :  { %v1065_v10 = vrot.slane %v775_v6, 6  ;;  %v1067_v11 = vrot.slane %v855_v7, 2  ;;  %v955_v34 = vadd.f32 %v954_v30, %v685_v29 }
 0x44c   :  { %v1066_v12 = vrot.slane %v815_v8, 4 }
 0x44d   :  { %v1072_v14 = vsel %vm1071_vm0, %v735_v9, %v1065_v10 }
 0x44e   :  { %v1074_v15 = vsel %vm1073_vm1, %v1066_v12, %v1067_v11 }
 0x44f   :  { %v1076_v16 = vsel %vm1075_vm2, %v1072_v14, %v1074_v15  ;;  %v874_v17 = vpop.f32.mrf.mxu3  ;;  %v914_v19 = vpop.f32.mrf.mxu2 }
 0x450   :  { %1082 = vst [vmem:[#allocation2] sm:$0xff] %v1076_v16  ;;  %v894_v18 = vpop.f32.mrf.mxu1  ;;  %v915_v32 = vadd.f32 %v914_v19, %v684_v28  ;;  %v875_v37 = vadd.f32 %v874_v17, %v683_v31 }
 0x452   :  { %v895_v42 = vadd.f32 %v894_v18, %v875_v37 }
 0x457   :  { %v1014_v20 = vpop.f32.mrf.mxu3 }
 0x458   :  { %v934_v22 = vpop.f32.mrf.mxu1 }
 0x459   :  { %v935_v35 = vadd.f32 %v934_v22, %v915_v32 }
 0x45b   :  { %v1068_v40 = vrot.slane %v935_v35, 6 }
 0x45d   :  { %v1077_v44 = vsel %vm1071_vm0, %v895_v42, %v1068_v40 }
 0x45f   :  { %v1054_v25 = vpop.f32.mrf.mxu3 }
 0x460   :  { %v974_v27 = vpop.f32.mrf.mxu1 }
 0x461   :  { %v975_v38 = vadd.f32 %v974_v27, %v955_v34 }
 0x463   :  { %v1069_v43 = vrot.slane %v975_v38, 4 }
 0x467   :  { %v1034_v23 = vpop.f32.mrf.mxu2 }
 0x468   :  { %v1035_v24 = vadd.f32 %v1128_v21, %v1034_v23 }
 0x46a   :  { %v1055_v26 = vadd.f32 %v1054_v25, %v1035_v24 }
 0x46c   :  { %1084 = vst [vmem:[#allocation2 + $0x10] sm:$0x3] %v1055_v26 }
 0x478   :  { %v994_v36 = vpop.f32.mrf.mxu1 }
 0x479   :  { %v995_v39 = vadd.f32 %v994_v36, %v686_v33 }
 0x47b   :  { %v1015_v41 = vadd.f32 %v1014_v20, %v995_v39 }
 0x47d   :  { %v1070_v13 = vrot.slane %v1015_v41, 2 }
 0x47f   :  { %v1078_v45 = vsel %vm1073_vm1, %v1069_v43, %v1070_v13 }
 0x480   :  { %v1079_v46 = vsel %vm1075_vm2, %v1077_v44, %v1078_v45 }
 0x481   :  { %1083 = vst [vmem:[#allocation2 + $0x8] sm:$0xff] %v1079_v46 }
 0x482   :  { %1095 = dma.vmem_to_hbm [thread:$0]  %s1091_s15, 288, %s1093_s17, [#allocation3]  }
 0x483   :  { %1165 = dma.done.wait [#allocation3], 288  }
 0x484   :  { %1166 = vsyncadd [#allocation3], 4294967008 }
 0x485   :  { %1100 = vsyncpa [#allocation3], 1 }

</bundles_post_ra>
